<compile_context>
chip_gen: v7x
topology: tpu7x:2x2x1
jax: 0.10.0
libtpu: 0.0.40
codegen_flags: <defaults>
</compile_context>

<pallas_src>
import functools
import math

import numpy as np

import jax
import jax.numpy as jnp
from jax import lax
from jax.experimental import pallas as pl
from jax.experimental.pallas import tpu as pltpu


def _cluster_loss_kernel(cc_ref, lhs_ref, par_ref, out_ref, acc_ref, *,
                         class_num, temperature):
    """One grid step handles TM rows of the (N, N) similarity matrix.

    cc_ref : (B, N)  full slab, resident across the grid (index_map constant)
    lhs_ref: (B, TM) columns for this block's rows
    par_ref: (B, TM) partner columns (wrapper pre-rolled by class_num)
    out_ref: (1, 1)  final loss, written once on the last step
    acc_ref: (1, 1)  VMEM scratch cross-entropy accumulator
    """
    C = class_num
    N = 2 * C
    inv_t = 1.0 / temperature
    step = pl.program_id(0)

    @pl.when(step == 0)
    def _init():
        acc_ref[...] = jnp.zeros_like(acc_ref)

    # ---- normalize BEFORE the matmul (O(B*N) / O(B*TM) VPU work) ----------
    cc = cc_ref[...]                                                  # (B, N)
    inv_n_full = lax.rsqrt(jnp.maximum(
        jnp.sum(cc * cc, axis=0, keepdims=True), 1e-16))              # (1, N)
    cc_hat = cc * inv_n_full                                          # (B, N)

    lcc = lhs_ref[...]                                                # (B, TM)
    inv_n_l = lax.rsqrt(jnp.maximum(
        jnp.sum(lcc * lcc, axis=0, keepdims=True), 1e-16))
    l_hat = lcc * inv_n_l
    l_hat_s = l_hat * inv_t            # fold 1/temperature into one operand

    pcc = par_ref[...]                                                # (B, TM)
    inv_n_p = lax.rsqrt(jnp.maximum(
        jnp.sum(pcc * pcc, axis=0, keepdims=True), 1e-16))
    p_hat = pcc * inv_n_p

    # ---- (N, TM) similarity slab on the MXU --------------------------------
    # sim_kt[k, t] = <cc_hat[:, k], cc_hat[:, row_t]> / T  = sim[row_t, k]
    sim_kt = lax.dot_general(cc_hat, l_hat_s, (((0,), (0,)), ((), ())),
                             preferred_element_type=jnp.float32)      # (N, TM)

    # diagonal (self) similarity and positive-partner similarity, O(B*TM)
    self_sim = jnp.sum(l_hat_s * l_hat, axis=0, keepdims=True)        # (1, TM)
    pos = jnp.sum(l_hat_s * p_hat, axis=0, keepdims=True)             # (1, TM)

    # ---- off-diagonal logsumexp without (N,N) iota/mask temporaries --------
    m = jnp.max(sim_kt, axis=0, keepdims=True)                        # (1, TM)
    ex_sum = jnp.sum(jnp.exp(sim_kt - m), axis=0, keepdims=True)      # (1, TM)
    off_sum = ex_sum - jnp.exp(self_sim - m)                          # drop diag
    lse = m + jnp.log(off_sum)

    acc_ref[...] += jnp.sum(lse - pos, keepdims=True)                 # (1, 1)

    @pl.when(step == pl.num_programs(0) - 1)
    def _finalize():
        # entropy regularizer (ne_i + ne_j) from the resident full slab
        s = jnp.sum(cc, axis=0, keepdims=True)                        # (1, N)
        lane = lax.broadcasted_iota(jnp.int32, (1, N), 1)
        is_i = lane < C
        mass_i = jnp.sum(jnp.where(is_i, s, 0.0), keepdims=True)      # (1, 1)
        mass_j = jnp.sum(jnp.where(is_i, 0.0, s), keepdims=True)      # (1, 1)
        p = s / jnp.where(is_i, mass_i, mass_j)                       # (1, N)
        ne = 2.0 * math.log(C) + jnp.sum(p * jnp.log(p), keepdims=True)
        out_ref[...] = acc_ref[...] / float(N) + ne


def _pick_row_block(N):
    # Largest lane-aligned row block dividing N, capped so the (N, TM) slab
    # (plus exp temporaries, ~3x) stays well inside v7x's 64 MiB VMEM.
    for cand in (256, 128):
        if N % cand == 0 and N * cand * 4 <= 8 * 1024 * 1024:
            return cand
    return N   # tiny / unaligned class counts: single full-width block


@functools.partial(jax.jit, static_argnums=(2, 3))
def cluster_loss(c_i, c_j, class_num, temperature):
    """Pallas implementation of ClusterLoss.forward (c_i, c_j: (B, class_num))."""
    B, C = c_i.shape
    assert C == class_num
    N = 2 * C

    # Layout plumbing only (no transposes): lane dim = N (usually 128-aligned).
    cc = jnp.concatenate([c_i, c_j], axis=1).astype(jnp.float32)      # (B, N)
    # Column n of cc_partner is the positive partner of column n (n <-> n±C).
    cc_partner = jnp.roll(cc, shift=C, axis=1)                        # (B, N)

    tm = _pick_row_block(N)
    num_blocks = N // tm

    kernel = functools.partial(_cluster_loss_kernel,
                               class_num=C, temperature=float(temperature))

    grid_spec = pltpu.PrefetchScalarGridSpec(
        num_scalar_prefetch=0,
        grid=(num_blocks,),
        in_specs=[
            pl.BlockSpec((B, N), lambda i: (0, 0)),    # resident full slab
            pl.BlockSpec((B, tm), lambda i: (0, i)),   # this block's columns
            pl.BlockSpec((B, tm), lambda i: (0, i)),   # partner columns
        ],
        out_specs=pl.BlockSpec((1, 1), lambda i: (0, 0)),
        scratch_shapes=[pltpu.VMEM((1, 1), jnp.float32)],
    )

    out = pl.pallas_call(
        kernel,
        out_shape=jax.ShapeDtypeStruct((1, 1), jnp.float32),
        grid_spec=grid_spec,
        compiler_params=pltpu.CompilerParams(
            dimension_semantics=("arbitrary",),       # accumulator carried
            vmem_limit_bytes=64 * 1024 * 1024),
    )(cc, cc, cc_partner)
    return out[0, 0]


def _numpy_reference(c_i, c_j, class_num, temperature):
    """Direct numpy port of the PyTorch forward for verification."""
    p_i = c_i.sum(0)
    p_i = p_i / p_i.sum()
    ne_i = math.log(p_i.size) + (p_i * np.log(p_i)).sum()
    p_j = c_j.sum(0)
    p_j = p_j / p_j.sum()
    ne_j = math.log(p_j.size) + (p_j * np.log(p_j)).sum()
    ne_loss = ne_i + ne_j

    N = 2 * class_num
    c = np.concatenate([c_i.T, c_j.T], axis=0)
    norm = np.linalg.norm(c, axis=1, keepdims=True)
    sim = (c @ c.T) / np.maximum(norm @ norm.T, 1e-8) / temperature
    sim_i_j = np.diag(sim, class_num)
    sim_j_i = np.diag(sim, -class_num)
    pos = np.concatenate([sim_i_j, sim_j_i]).reshape(N, 1)
    mask = np.ones((N, N), dtype=bool)
    np.fill_diagonal(mask, False)
    for i in range(class_num):
        mask[i, class_num + i] = False
        mask[class_num + i, i] = False
    neg = sim[mask].reshape(N, -1)
    logits = np.concatenate([pos, neg], axis=1)
    m = logits.max(axis=1, keepdims=True)
    lse = (m + np.log(np.exp(logits - m).sum(axis=1, keepdims=True))).squeeze(1)
    ce = (lse - logits[:, 0]).sum()
    return ce / N + ne_loss


if __name__ == "__main__":
    class_num = 256          # N = 512, row block 256 -> 2 grid steps
    batch = 32
    temperature = 0.5

    key = jax.random.PRNGKey(0)
    k1, k2 = jax.random.split(key)
    # cluster-assignment probabilities: softmax over the cluster dim
    c_i = jax.nn.softmax(jax.random.normal(k1, (batch, class_num), jnp.float32), axis=1)
    c_j = jax.nn.softmax(jax.random.normal(k2, (batch, class_num), jnp.float32), axis=1)

    loss = cluster_loss(c_i, c_j, class_num, temperature)
    loss = jax.block_until_ready(loss)

    ref = _numpy_reference(np.asarray(c_i, np.float64), np.asarray(c_j, np.float64),
                           class_num, temperature)
    np.testing.assert_allclose(float(loss), ref, rtol=1e-4, atol=1e-4)
    print("KERNEL_OK")
</pallas_src>

<mosaic_0001>
module attributes {stable_mosaic.version = 11 : i64} {
  func.func @_cluster_loss_kernel(%arg0: i32, %arg1: memref<32x512xf32, #tpu.memory_space<vmem>>, %arg2: memref<32x256xf32, #tpu.memory_space<vmem>>, %arg3: memref<32x256xf32, #tpu.memory_space<vmem>>, %arg4: memref<1x1xf32, #tpu.memory_space<vmem>>, %arg5: memref<1x1xf32, #tpu.memory_space<vmem>>) attributes {dimension_semantics = [#tpu.dimension_semantics<arbitrary>], iteration_bounds = array<i64: 2>, scalar_prefetch = 0 : i64, scratch_operands = 1 : i64, tpu.core_type = #tpu.core_type<tc>, window_params = [{pipeline_mode = #tpu.pipeline_mode<synchronous>, transform_indices = @transform_0, window_bounds = array<i64: 32, 512>}, {transform_indices = @transform_1, window_bounds = array<i64: 32, 256>}, {transform_indices = @transform_2, window_bounds = array<i64: 32, 256>}, {pipeline_mode = #tpu.pipeline_mode<synchronous>, transform_indices = @transform_3, window_bounds = array<i64: 1, 1>}]} {
    %c0_i32 = arith.constant 0 : i32
    %0 = arith.cmpi eq, %arg0, %c0_i32 : i32
    %1 = arith.extui %0 : i1 to i32
    %c0_i32_0 = arith.constant 0 : i32
    %2 = arith.cmpi ne, %1, %c0_i32_0 : i32
    scf.if %2 {
      %cst_23 = arith.constant 0.000000e+00 : f32
      %63 = vector.broadcast %cst_23 : f32 to vector<1x1xf32>
      %c0_24 = arith.constant 0 : index
      %c0_25 = arith.constant 0 : index
      %64 = vector.load %arg5[%c0_24, %c0_25] : memref<1x1xf32, #tpu.memory_space<vmem>>, vector<1x1xf32>
      tpu.vector_store %arg5[%c0_24, %c0_25], %63 {strides = array<i32>} : memref<1x1xf32, #tpu.memory_space<vmem>>, vector<1x1xf32>,
    } else {
    }
    %c0 = arith.constant 0 : index
    %c0_1 = arith.constant 0 : index
    %3 = vector.load %arg1[%c0, %c0_1] : memref<32x512xf32, #tpu.memory_space<vmem>>, vector<32x512xf32>
    %4 = arith.mulf %3, %3 : vector<32x512xf32>
    %cst = arith.constant dense<0.000000e+00> : vector<512xf32>
    %5 = vector.multi_reduction <add>, %4, %cst [0] : vector<32x512xf32> to vector<512xf32>
    %6 = vector.shape_cast %5 : vector<512xf32> to vector<1x512xf32>
    %cst_2 = arith.constant 1.000000e-16 : f32
    %7 = vector.broadcast %cst_2 : f32 to vector<1x512xf32>
    %8 = arith.maximumf %6, %7 : vector<1x512xf32>
    %9 = math.rsqrt %8 : vector<1x512xf32>
    %10 = vector.broadcast %9 : vector<1x512xf32> to vector<32x512xf32>
    %11 = arith.mulf %3, %10 : vector<32x512xf32>
    %c0_3 = arith.constant 0 : index
    %c0_4 = arith.constant 0 : index
    %12 = vector.load %arg2[%c0_3, %c0_4] : memref<32x256xf32, #tpu.memory_space<vmem>>, vector<32x256xf32>
    %13 = arith.mulf %12, %12 : vector<32x256xf32>
    %cst_5 = arith.constant dense<0.000000e+00> : vector<256xf32>
    %14 = vector.multi_reduction <add>, %13, %cst_5 [0] : vector<32x256xf32> to vector<256xf32>
    %15 = vector.shape_cast %14 : vector<256xf32> to vector<1x256xf32>
    %cst_6 = arith.constant 1.000000e-16 : f32
    %16 = vector.broadcast %cst_6 : f32 to vector<1x256xf32>
    %17 = arith.maximumf %15, %16 : vector<1x256xf32>
    %18 = math.rsqrt %17 : vector<1x256xf32>
    %19 = vector.broadcast %18 : vector<1x256xf32> to vector<32x256xf32>
    %20 = arith.mulf %12, %19 : vector<32x256xf32>
    %cst_7 = arith.constant 2.000000e+00 : f32
    %21 = vector.broadcast %cst_7 : f32 to vector<32x256xf32>
    %22 = arith.mulf %20, %21 : vector<32x256xf32>
    %c0_8 = arith.constant 0 : index
    %c0_9 = arith.constant 0 : index
    %23 = vector.load %arg3[%c0_8, %c0_9] : memref<32x256xf32, #tpu.memory_space<vmem>>, vector<32x256xf32>
    %24 = arith.mulf %23, %23 : vector<32x256xf32>
    %cst_10 = arith.constant dense<0.000000e+00> : vector<256xf32>
    %25 = vector.multi_reduction <add>, %24, %cst_10 [0] : vector<32x256xf32> to vector<256xf32>
    %26 = vector.shape_cast %25 : vector<256xf32> to vector<1x256xf32>
    %cst_11 = arith.constant 1.000000e-16 : f32
    %27 = vector.broadcast %cst_11 : f32 to vector<1x256xf32>
    %28 = arith.maximumf %26, %27 : vector<1x256xf32>
    %29 = math.rsqrt %28 : vector<1x256xf32>
    %30 = vector.broadcast %29 : vector<1x256xf32> to vector<32x256xf32>
    %31 = arith.mulf %23, %30 : vector<32x256xf32>
    %cst_12 = arith.constant dense<0.000000e+00> : vector<512x256xf32>
    %32 = tpu.matmul %11, %22, %cst_12 {dimension_numbers = #tpu.dot_dimension_numbers<[0], [0], [1], [1], [0, 1, 1, 1], [], []>} : vector<32x512xf32>, vector<32x256xf32>, vector<512x256xf32> -> vector<512x256xf32>
    %33 = arith.mulf %22, %20 : vector<32x256xf32>
    %cst_13 = arith.constant dense<0.000000e+00> : vector<256xf32>
    %34 = vector.multi_reduction <add>, %33, %cst_13 [0] : vector<32x256xf32> to vector<256xf32>
    %35 = vector.shape_cast %34 : vector<256xf32> to vector<1x256xf32>
    %36 = arith.mulf %22, %31 : vector<32x256xf32>
    %cst_14 = arith.constant dense<0.000000e+00> : vector<256xf32>
    %37 = vector.multi_reduction <add>, %36, %cst_14 [0] : vector<32x256xf32> to vector<256xf32>
    %38 = vector.shape_cast %37 : vector<256xf32> to vector<1x256xf32>
    %cst_15 = arith.constant dense<0xFF800000> : vector<256xf32>
    %39 = vector.multi_reduction <maximumf>, %32, %cst_15 [0] : vector<512x256xf32> to vector<256xf32>
    %40 = vector.shape_cast %39 : vector<256xf32> to vector<1x256xf32>
    %41 = vector.broadcast %40 : vector<1x256xf32> to vector<512x256xf32>
    %42 = arith.subf %32, %41 : vector<512x256xf32>
    %43 = math.exp %42 : vector<512x256xf32>
    %cst_16 = arith.constant dense<0.000000e+00> : vector<256xf32>
    %44 = vector.multi_reduction <add>, %43, %cst_16 [0] : vector<512x256xf32> to vector<256xf32>
    %45 = vector.shape_cast %44 : vector<256xf32> to vector<1x256xf32>
    %46 = arith.subf %35, %40 : vector<1x256xf32>
    %47 = math.exp %46 : vector<1x256xf32>
    %48 = arith.subf %45, %47 : vector<1x256xf32>
    %49 = math.log %48 : vector<1x256xf32>
    %50 = arith.addf %40, %49 : vector<1x256xf32>
    %c0_17 = arith.constant 0 : index
    %c0_18 = arith.constant 0 : index
    %51 = vector.load %arg5[%c0_17, %c0_18] : memref<1x1xf32, #tpu.memory_space<vmem>>, vector<1x1xf32>
    %52 = arith.subf %50, %38 : vector<1x256xf32>
    %53 = vector.shape_cast %52 : vector<1x256xf32> to vector<1x1x256xf32>
    %cst_19 = arith.constant dense<0.000000e+00> : vector<1xf32>
    %54 = vector.multi_reduction <add>, %53, %cst_19 [1, 2] : vector<1x1x256xf32> to vector<1xf32>
    %55 = vector.shape_cast %54 : vector<1xf32> to vector<1x1x1xf32>
    %56 = vector.extract %55[0, 0, 0] : f32 from vector<1x1x1xf32>
    %57 = vector.broadcast %56 : f32 to vector<1x1xf32>
    %58 = arith.addf %51, %57 : vector<1x1xf32>
    %c0_20 = arith.constant 0 : index
    %c0_21 = arith.constant 0 : index
    %59 = vector.load %arg5[%c0_20, %c0_21] : memref<1x1xf32, #tpu.memory_space<vmem>>, vector<1x1xf32>
    tpu.vector_store %arg5[%c0_20, %c0_21], %58 {strides = array<i32>} : memref<1x1xf32, #tpu.memory_space<vmem>>, vector<1x1xf32>,
    %c1_i32 = arith.constant 1 : i32
    %60 = arith.cmpi eq, %arg0, %c1_i32 : i32
    %61 = arith.extui %60 : i1 to i32
    %c0_i32_22 = arith.constant 0 : i32
    %62 = arith.cmpi ne, %61, %c0_i32_22 : i32
    scf.if %62 {
      %cst_23 = arith.constant dense<0.000000e+00> : vector<512xf32>
      %63 = vector.multi_reduction <add>, %3, %cst_23 [0] : vector<32x512xf32> to vector<512xf32>
      %64 = vector.shape_cast %63 : vector<512xf32> to vector<1x512xf32>
      %65 = tpu.iota {dimensions = array<i32: 1>} : vector<1x512xi32>
      %c256_i32 = arith.constant 256 : i32
      %66 = vector.broadcast %c256_i32 : i32 to vector<1x512xi32>
      %67 = arith.cmpi slt, %65, %66 : vector<1x512xi32>
      %cst_24 = arith.constant 0.000000e+00 : f32
      %68 = vector.broadcast %cst_24 : f32 to vector<1x512xf32>
      %69 = arith.select %67, %64, %68 : vector<1x512xi1>, vector<1x512xf32>
      %70 = vector.shape_cast %69 : vector<1x512xf32> to vector<1x1x512xf32>
      %cst_25 = arith.constant dense<0.000000e+00> : vector<1xf32>
      %71 = vector.multi_reduction <add>, %70, %cst_25 [1, 2] : vector<1x1x512xf32> to vector<1xf32>
      %72 = vector.shape_cast %71 : vector<1xf32> to vector<1x1x1xf32>
      %73 = vector.extract %72[0, 0, 0] : f32 from vector<1x1x1xf32>
      %74 = vector.broadcast %73 : f32 to vector<1x1xf32>
      %cst_26 = arith.constant 0.000000e+00 : f32
      %75 = vector.broadcast %cst_26 : f32 to vector<1x512xf32>
      %76 = arith.select %67, %75, %64 : vector<1x512xi1>, vector<1x512xf32>
      %77 = vector.shape_cast %76 : vector<1x512xf32> to vector<1x1x512xf32>
      %cst_27 = arith.constant dense<0.000000e+00> : vector<1xf32>
      %78 = vector.multi_reduction <add>, %77, %cst_27 [1, 2] : vector<1x1x512xf32> to vector<1xf32>
      %79 = vector.shape_cast %78 : vector<1xf32> to vector<1x1x1xf32>
      %80 = vector.extract %79[0, 0, 0] : f32 from vector<1x1x1xf32>
      %81 = vector.broadcast %80 : f32 to vector<1x1xf32>
      %82 = vector.shape_cast %74 : vector<1x1xf32> to vector<1x1xf32>
      %83 = vector.broadcast %82 : vector<1x1xf32> to vector<1x512xf32>
      %84 = vector.shape_cast %81 : vector<1x1xf32> to vector<1x1xf32>
      %85 = vector.broadcast %84 : vector<1x1xf32> to vector<1x512xf32>
      %86 = arith.select %67, %83, %85 : vector<1x512xi1>, vector<1x512xf32>
      %87 = arith.divf %64, %86 : vector<1x512xf32>
      %88 = math.log %87 : vector<1x512xf32>
      %89 = arith.mulf %87, %88 : vector<1x512xf32>
      %90 = vector.shape_cast %89 : vector<1x512xf32> to vector<1x1x512xf32>
      %cst_28 = arith.constant dense<0.000000e+00> : vector<1xf32>
      %91 = vector.multi_reduction <add>, %90, %cst_28 [1, 2] : vector<1x1x512xf32> to vector<1xf32>
      %92 = vector.shape_cast %91 : vector<1xf32> to vector<1x1x1xf32>
      %93 = vector.extract %92[0, 0, 0] : f32 from vector<1x1x1xf32>
      %94 = vector.broadcast %93 : f32 to vector<1x1xf32>
      %cst_29 = arith.constant 11.0903549 : f32
      %95 = vector.broadcast %cst_29 : f32 to vector<1x1xf32>
      %96 = arith.addf %95, %94 : vector<1x1xf32>
      %c0_30 = arith.constant 0 : index
      %c0_31 = arith.constant 0 : index
      %97 = vector.load %arg5[%c0_30, %c0_31] : memref<1x1xf32, #tpu.memory_space<vmem>>, vector<1x1xf32>
      %cst_32 = arith.constant 5.120000e+02 : f32
      %98 = vector.broadcast %cst_32 : f32 to vector<1x1xf32>
      %99 = arith.divf %97, %98 : vector<1x1xf32>
      %100 = arith.addf %99, %96 : vector<1x1xf32>
      %c0_33 = arith.constant 0 : index
      %c0_34 = arith.constant 0 : index
      %101 = vector.load %arg4[%c0_33, %c0_34] : memref<1x1xf32, #tpu.memory_space<vmem>>, vector<1x1xf32>
      tpu.vector_store %arg4[%c0_33, %c0_34], %100 {strides = array<i32>} : memref<1x1xf32, #tpu.memory_space<vmem>>, vector<1x1xf32>,
    } else {
    }
    return
  }
  func.func @transform_0(%arg0: i32) -> (i32, i32) {
    %c0_i32 = arith.constant 0 : i32
    %c0_i32_0 = arith.constant 0 : i32
    %c0_i32_1 = arith.constant 0 : i32
    return %c0_i32, %c0_i32_0 : i32, i32
  }
  func.func @transform_1(%arg0: i32) -> (i32, i32) {
    %c0_i32 = arith.constant 0 : i32
    %c0_i32_0 = arith.constant 0 : i32
    return %c0_i32, %arg0 : i32, i32
  }
  func.func @transform_2(%arg0: i32) -> (i32, i32) {
    %c0_i32 = arith.constant 0 : i32
    %c0_i32_0 = arith.constant 0 : i32
    return %c0_i32, %arg0 : i32, i32
  }
  func.func @transform_3(%arg0: i32) -> (i32, i32) {
    %c0_i32 = arith.constant 0 : i32
    %c0_i32_0 = arith.constant 0 : i32
    %c0_i32_1 = arith.constant 0 : i32
    return %c0_i32, %c0_i32_0 : i32, i32
  }
}

</mosaic_0001>

<bundles_post_ra>
// kernel: cluster_loss.1
= control target key start
LH: loop header
LB: loop body
LE: loop exit
PB: predicated region body
PF: predicated region fallthrough
CT: control target
= control target key end

     0   :  { %8 = vsyncpa [#allocation4], 0  ;;  %s4105_s0 = inlined_call_operand.hbm [shape: f32[32,512], index: 0, kind: input, shape index: {}, may-alias: {0,1}]   ;;  %s4106_s1 = inlined_call_operand.hbm [shape: f32[32,512], index: 1, kind: input, shape index: {}, may-alias: {0,1}]   ;;  %s4107_s2 = inlined_call_operand.hbm [shape: f32[32,512], index: 2, kind: input, shape index: {}]   ;;  %s4108_s3 = inlined_call_operand.hbm [shape: f32[1,1], index: 3, kind: output, shape index: {}]  }
   0x1   :  { %9 = vsyncpa [#allocation7], 0 }
   0x2   :  { %11 = vsyncpa [#allocation7 + $0x1], 0 }
   0x3   :  { %12 = vsyncpa [#allocation5], 0  ;;  %s2830_s12 = smov 0   ;;  %s2832_s13 = smov 0  }
   0x4   :  { %s2834_s14 = smov 0   ;;  %s2836_s15 = smov 0  }
   0x5 LB: > { %s2851_s16 = sadd.s32 1, %s2798_s15   ;;  %s46_s17 = sadd.s32 1, %s2794_s14  ;;  %s2798_s15 = sphi %s2836_s15, %s4440_s15   ;;  %s2794_s14 = sphi %s2834_s14, %s4439_s14   ;;  %s2790_s13 = sphi %s2832_s13, %s4438_s13   ;;  %s2786_s12 = sphi %s2830_s12, %s4437_s12  }
   0x6   : > { %s43_s18 = ssub.s32 %s2798_s15, %s2851_s16  ;;  %p53_p0 = scmp.ne.s32.totalorder %s2794_s14, %s2790_s13 }
   0x7   : > { %p44_p1 = scmp.eq.s32.totalorder %s43_s18, 0  ;;  %p54_p2 = scmp.eq.s32.totalorder %s2798_s15, 0 }
   0x8   : > { %p2302_p4 = scmp.lt.s32.totalorder %s2798_s15, 2  ;;  %s143_s20 = sand.u32 1, %s2798_s15  }
   0x9   : > { %s2860_s19 = scalar_select %p44_p1, %s2794_s14, %s46_s17  }
   0xa   : > { %p55_p3 = por %p54_p2, %p53_p0  ;;  %s145_s21 = sand.u32 1, %s2794_s14  }
   0xb   : > { %s2865_s22 = sshll.u32 %s145_s21, 6  ;;  %s2256_s23 = sshll.u32 %s2798_s15, 8 }
   0xc   : > { %s2873_s26 = scalar_lea.hbm %s4106_s1, %s2256_s23  ;;  %s147_s27 = scalar_lea.vmem [#allocation6], %s2865_s22 }
   0xd   : > { %s154_s28 = sshll.u32 %s147_s27, 4  ;;  %p2878_p5 = pnand %p2302_p4, %p55_p3  ;;  %s2876_s28 = int_to_ptr.vmem [resolvable:$true] %s154_s28 }
   0xe   : > { %s2882_s30 = scalar_lea.sflag [#allocation7], %s143_s20  ;;  %s2642_s4 = scalar_lea.hbm %s2873_s26, 1024 }
   0xf   : > { %p2643_p6 = scmp.ne.s32.totalorder %s2873_s26, %s2642_s4  ;;  %p2644_p7 = pneg %p2878_p5 }
  0x10   : > { %s2647_s7 = scalar_lea.hbm %s4106_s1, 2048  ;;  %p2648_p10 = scmp.lt.u32.totalorder %s2873_s26, %s4106_s1 }
  0x11   : > { %p2645_p8 = pnand %p2644_p7, %p2643_p6  ;;  %p2649_p11 = scmp.lt.u32.totalorder %s2647_s7, %s2642_s4 }
  0x12   : > { %p2651_p13 = scmp.lt.u32.totalorder %s2642_s4, %s2873_s26 }
  0x13   : > { %p2646_p9 = pneg %p2645_p8  ;;  %p2650_p12 = por %p2649_p11, %p2648_p10 }
  0x15   : > { %p2652_p0 = por %p2651_p13, %p2650_p12 }
  0x17   : > { %p2653_p1 = pnand %p2652_p0, %p2646_p9 }
  0x19   : > { %2656 = shalt.err (!%p2653_p1)
}
  0x1a   : > { %s2657_s10 = scalar_lea.vmem %s2876_s28, 1024  ;;  %s2800_s11 = smov [#allocation6]  }
  0x1b   : > { %p2658_p2 = scmp.ne.s32.totalorder %s2876_s28, %s2657_s10  ;;  %s2662_s17 = sshll.u32 %s2800_s11, 4  ;;  %s2663_s17 = int_to_ptr.vmem [resolvable:$false] %s2662_s17 }
  0x1c   : > { %s2664_s18 = scalar_lea.vmem %s2663_s17, 2048  ;;  %p2665_p6 = scmp.lt.s32.totalorder %s2876_s28, %s2663_s17 }
  0x1d   : > { %p2660_p3 = pnand %p2658_p2, %p2644_p7  ;;  %p2666_p8 = scmp.lt.s32.totalorder %s2664_s18, %s2657_s10 }
  0x1f   : > { %p2661_p4 = pneg %p2660_p3  ;;  %p2667_p10 = por %p2666_p8, %p2665_p6 }
  0x21   : > { %p2668_p11 = pnand %p2667_p10, %p2661_p4 }
  0x23   : > { %2671 = shalt.err (!%p2668_p11)
}
  0x24   : > { %s2801_s20 = smov 512   ;;  %s2802_s21 = smov 256  }
  0x25   : > { %s2803_s24 = smov 16   ;;  %s2918_s4 = scalar_lea.hbm %s4107_s2, %s2256_s23 }
  0x26   : > { %2297 = dma.hbm_to_vmem [thread:$0]  (!%p2878_p5), %s2873_s26, 1024, %s2876_s28, %s2882_s30, %s2801_s20, %s2802_s21, %s2803_s24  }
  0x27   : > { %s168_s5 = scalar_lea.vmem [#allocation8], %s2865_s22  ;;  %s2924_s7 = sadd.s32 4294967295, %s2798_s15  }
  0x28   : > { %s175_s6 = sshll.u32 %s168_s5, 4  ;;  %p59_p9 = scmp.ne.s32.totalorder %s2790_s13, %s2786_s12  ;;  %s2921_s6 = int_to_ptr.vmem [resolvable:$true] %s175_s6 }
  0x29   : > { %p4109_p12 = scmp.eq.s32.totalorder %s2924_s7, 0  ;;  %p2173_p13 = scmp.ge.s32.totalorder %s2798_s15, 1 }
  0x2a   : > { %p117_p0 = scmp.lt.s32.totalorder %s2798_s15, 3  ;;  %s2804_s26 = smov [#allocation3]  }
  0x2b   : > { %p2933_p1 = por %p4109_p12, %p59_p9  ;;  %s2942_s28 = sshll.u32 %s2804_s26, 4  ;;  %s130_s28 = int_to_ptr.vmem [resolvable:$true] %s2942_s28 }
  0x2c   : > { %p2938_p3 = pnand %p2173_p13, %p117_p0  ;;  %s2672_s12 = scalar_lea.hbm %s2918_s4, 1024 }
  0x2d   : > { %s4217_s23 = scalar_select %p2933_p1, 1, 0 }
  0x2e   : > { %s4218_s22 = scalar_select %p2938_p3, 1, 0 }
  0x2f   : > { %p2673_p6 = scmp.ne.s32.totalorder %s2918_s4, %s2672_s12  ;;  %s2677_s9 = scalar_lea.hbm %s4107_s2, 2048 }
  0x30   : > { %p2678_p11 = scmp.lt.u32.totalorder %s2918_s4, %s4107_s2  ;;  %p2679_p9 = scmp.lt.u32.totalorder %s2677_s9, %s2672_s12 }
  0x31   : > { %p2675_p8 = pnand %p2673_p6, %p2644_p7  ;;  %p2681_p0 = scmp.lt.u32.totalorder %s2672_s12, %s2918_s4 }
  0x32   : > { %p2680_p13 = por %p2679_p9, %p2678_p11 }
  0x33   : > { %p2676_p10 = pneg %p2675_p8 }
  0x34   : > { %p2682_p2 = por %p2681_p0, %p2680_p13 }
  0x36   : > { %p2683_p12 = pnand %p2682_p2, %p2676_p10 }
  0x38   : > { %2686 = shalt.err (!%p2683_p12)
}
  0x39   : > { %s2687_s17 = scalar_lea.vmem %s2921_s6, 1024  ;;  %s2805_s18 = smov [#allocation8]  }
  0x3a   : > { %p2688_p6 = scmp.ne.s32.totalorder %s2921_s6, %s2687_s17  ;;  %s2692_s25 = sshll.u32 %s2805_s18, 4  ;;  %s2693_s25 = int_to_ptr.vmem [resolvable:$false] %s2692_s25 }
  0x3b   : > { %s2694_s27 = scalar_lea.vmem %s2693_s25, 2048  ;;  %p2695_p1 = scmp.lt.s32.totalorder %s2921_s6, %s2693_s25 }
  0x3c   : > { %p2690_p8 = pnand %p2688_p6, %p2644_p7  ;;  %p2696_p11 = scmp.lt.s32.totalorder %s2694_s27, %s2687_s17 }
  0x3e   : > { %p2691_p4 = pneg %p2690_p8  ;;  %p2697_p9 = por %p2696_p11, %p2695_p1 }
  0x40   : > { %p2698_p13 = pnand %p2697_p9, %p2691_p4 }
  0x42   : > { %2701 = shalt.err (!%p2698_p13)
}
  0x43   : > { %2300 = dma.hbm_to_vmem [thread:$0]  (!%p2878_p5), %s2918_s4, 1024, %s2921_s6, %s2882_s30, %s2801_s20, %s2802_s21, %s2803_s24  }
  0x44   : > { %p4219_p7 = scmp.eq.s32.totalorder %s2924_s7, 0  ;;  %p4220_p12 = pneg %p2938_p3 }
  0x45   : > { %s2702_s12 = scalar_lea.hbm %s4105_s0, 2048 }
  0x46   : > { %p2979_p2 = pnand %p4220_p12, %p4219_p7  ;;  %p2703_p1 = scmp.ne.s32.totalorder %s4105_s0, %s2702_s12 }
  0x47   : > { %p2709_p0 = scmp.lt.u32.totalorder %s2702_s12, %s4105_s0 }
  0x48   : > { %p2704_p4 = pneg %p2979_p2 }
  0x4a   : > { %p2705_p5 = pnand %p2704_p4, %p2703_p1 }
  0x4c   : > { %p2706_p10 = pneg %p2705_p5 }
  0x4e   : > { %p2711_p6 = pnand %p2709_p0, %p2706_p10 }
  0x50   : > { %2714 = shalt.err (!%p2711_p6)
}
  0x51   : > { %s2715_s24 = scalar_lea.vmem %s130_s28, 2048  ;;  %p2723_p13 = scmp.lt.s32.totalorder %s130_s28, %s130_s28 }
  0x52   : > { %p2716_p8 = scmp.ne.s32.totalorder %s130_s28, %s2715_s24  ;;  %p2724_p7 = scmp.lt.s32.totalorder %s2715_s24, %s2715_s24 }
  0x54   : > { %p2718_p11 = pnand %p2716_p8, %p2704_p4  ;;  %p2725_p12 = por %p2724_p7, %p2723_p13 }
  0x56   : > { %p2719_p9 = pneg %p2718_p11 }
  0x58   : > { %p2726_p3 = pnand %p2725_p12, %p2719_p9 }
  0x5a   : > { %2729 = shalt.err (!%p2726_p3)
}
  0x5b   : > { %s2806_s4 = smov 32   ;;  %p4222_p1 = scmp.ne.s32.totalorder %s4218_s22, 0 }
  0x5c   : > { %2293 = dma.hbm_to_vmem [thread:$0]  (!%p2979_p2), %s4105_s0, 2048, %s130_s28, [#allocation4], %s2801_s20, %s2801_s20, %s2806_s4  }
  0x5d   : > { %187 = sbr.rel (%p4222_p1) target bundleno = 1510 (0x5e6), region = 32 }
  0x64   : > { %p4223_p4 = scmp.eq.s32.totalorder %s2924_s7, 0 }
  0x66   : > { %2773 = dma.done.wait (%p4223_p4), [#allocation4], 2048   ;;  %p4224_p5 = pmov %p4223_p4 }
  0x67   : > { %s193_s10 = sand.u32 1, %s2924_s7   ;;  %s195_s11 = sand.u32 1, %s2790_s13  }
  0x68   : > { %2775 = vsyncadd (%p4224_p5), [#allocation4], 4294965248  ;;  %s2184_s17 = sshll.u32 %s195_s11, 6  ;;  %s194_s18 = scalar_lea.sflag [#allocation7], %s193_s10 }
  0x69   : > { %s3009_s25 = scalar_lea.vmem [#allocation6], %s2184_s17  ;;  %p4225_p3 = scmp.ne.s32.totalorder %s4217_s23, 0 }
  0x6b   : > { %2777 = dma.done.wait (%p4225_p3), %s194_s18, 2048  }
  0x6c   : > { %2779 = vsyncadd (%p4225_p3), %s194_s18, 4294965248  ;;  %s3015_s20 = scalar_lea.vmem [#allocation8], %s2184_s17  ;;  %p4226_p2 = scmp.ne.s32.totalorder %s2924_s7, 0 }
  0x6d   : > { %vm235_vm0 = vcmask (!%p4226_p2), 0   ;;  %v2807_v0 = vmov (!%p4226_p2), 0.0  }
  0x6e   : > { %234 = sbr.rel (%p4226_p2) target bundleno = 117 (0x75), region = 48  ;;  %236 = vst.msk [vmem:[#allocation2] sm:$0x1] (!%p4226_p2), %vm235_vm0, %v2807_v0 }
  0x75 PF: > { %v3019_v1 = vld [vmem:[#allocation3] sm:$0xff]  ;;  %v3033_v8 = vld [vmem:[#allocation3 + $0x10] sm:$0xff]  ;;  %v2808_v10 = vmov 0.0   ;;  %v3054_v21 = vld [vmem:[%s3009_s25 + $0x8] sm:$0xff]  ;;  %vm557_vm1 = vcmask 261120   ;;  %vm1928_vm2 = vcmask 1040384  }
  0x76   : > { %4227 = vst [vmem:[#allocation13_spill] sm:$0xff] %v3019_v1  ;;  %v3021_v2 = vld [vmem:[#allocation3 + $0x20] sm:$0xff]  ;;  %v253_v5 = vmul.f32 %v3019_v1, %v3019_v1  ;;  %4231 = vst [vmem:[#allocation17_spill] sm:$0xff] %v3033_v8  ;;  %v3035_v9 = vld [vmem:[#allocation3 + $0x30] sm:$0xff]  ;;  %814 = vmatprep.mubr.f32.mxu0 %v2808_v10  ;;  %1006 = vmatprep.mubr.f32.mxu1 %v2808_v10  ;;  %v255_v13 = vmul.f32 %v3033_v8, %v3033_v8  ;;  %vm1943_vm3 = vcmask 0   ;;  %p2251_p10 = scmp.ne.s32.totalorder %s2924_s7, 1 }
  0x77   : > { %4228 = vst [vmem:[#allocation14_spill] sm:$0xff] %v3021_v2  ;;  %v3023_v3 = vld [vmem:[#allocation3 + $0x40] sm:$0xff]  ;;  %v257_v6 = vmul.f32 %v3021_v2, %v3021_v2  ;;  %4232 = vst [vmem:[#allocation18_spill] sm:$0xff] %v3035_v9  ;;  %v3039_v11 = vld [vmem:[#allocation3 + $0x50] sm:$0xff]  ;;  %v259_v14 = vmul.f32 %v3035_v9, %v3035_v9  ;;  %v338_v26 = vmul.f32 %v3054_v21, %v3054_v21 }
  0x78   : > { %4229 = vst [vmem:[#allocation15_spill] sm:$0xff] %v3023_v3  ;;  %v3025_v4 = vld [vmem:[#allocation3 + $0x60] sm:$0xff]  ;;  %v261_v7 = vmul.f32 %v3023_v3, %v3023_v3  ;;  %4233 = vst [vmem:[#allocation19_spill] sm:$0xff] %v3039_v11  ;;  %v3041_v12 = vld [vmem:[#allocation3 + $0x70] sm:$0xff]  ;;  %v263_v17 = vmul.f32 %v3039_v11, %v3039_v11 }
  0x79   : > { %4230 = vst [vmem:[#allocation16_spill] sm:$0xff] %v3025_v4  ;;  %4234 = vst [vmem:[#allocation20_spill] sm:$0xff] %v3041_v12  ;;  %v265_v15 = vmul.f32 %v3025_v4, %v3025_v4  ;;  %v269_v16 = vadd.f32 %v257_v6, %v253_v5  ;;  %v267_v18 = vmul.f32 %v3041_v12, %v3041_v12  ;;  %v3057_v22 = vld [vmem:[%s3009_s25 + $0x18] sm:$0xff]  ;;  %v3060_v24 = vld [vmem:[%s3009_s25 + $0x28] sm:$0xff] }
  0x7a   : > { %v287_v19 = vadd.f32 %v259_v14, %v255_v13  ;;  %v3063_v25 = vld [vmem:[%s3009_s25 + $0x38] sm:$0xff]  ;;  %v3068_v27 = vld [vmem:[%s3015_s20 + $0x8] sm:$0xff]  ;;  %v340_v29 = vmul.f32 %v3057_v22, %v3057_v22  ;;  %v342_v30 = vmul.f32 %v3060_v24, %v3060_v24  ;;  %v3086_v40 = vld [vmem:[%s3009_s25] sm:$0xff] }
  0x7b   : > { %v270_v20 = vadd.f32 %v269_v16, %v261_v7  ;;  %v3075_v31 = vld [vmem:[%s3015_s20 + $0x18] sm:$0xff]  ;;  %v388_v32 = vld [vmem:[%s3015_s20 + $0x28] sm:$0xff]  ;;  %v392_v35 = vmul.f32 %v3068_v27, %v3068_v27  ;;  %v344_v37 = vmul.f32 %v3063_v25, %v3063_v25  ;;  %v3089_v41 = vld [vmem:[%s3009_s25 + $0x10] sm:$0xff]  ;;  %v337_v50 = vmul.f32 %v3086_v40, %v3086_v40 }
  0x7c   : > { %v288_v23 = vadd.f32 %v287_v19, %v263_v17  ;;  %v390_v34 = vld [vmem:[%s3015_s20 + $0x38] sm:$0xff]  ;;  %v354_v38 = vadd.f32 %v340_v29, %v338_v26  ;;  %v394_v39 = vmul.f32 %v3075_v31, %v3075_v31  ;;  %v396_v43 = vmul.f32 %v388_v32, %v388_v32  ;;  %v3092_v48 = vld [vmem:[%s3009_s25 + $0x20] sm:$0xff]  ;;  %v3099_v55 = vld [vmem:[%s3009_s25 + $0x30] sm:$0xff] }
  0x7d   : > { %v271_v28 = vadd.f32 %v270_v20, %v265_v15  ;;  %v398_v46 = vmul.f32 %v390_v34, %v390_v34  ;;  %v339_v51 = vmul.f32 %v3089_v41, %v3089_v41  ;;  %v341_v57 = vmul.f32 %v3092_v48, %v3092_v48  ;;  %v3106_v7 = vld [vmem:[%s3015_s20] sm:$0xff]  ;;  %v3109_v13 = vld [vmem:[%s3015_s20 + $0x10] sm:$0xff] }
  0x7e   : > { %v289_v33 = vadd.f32 %v288_v23, %v267_v18  ;;  %v355_v45 = vadd.f32 %v354_v38, %v342_v30  ;;  %v408_v47 = vadd.f32 %v394_v39, %v392_v35  ;;  %v343_v62 = vmul.f32 %v3099_v55, %v3099_v55  ;;  %v387_v19 = vld [vmem:[%s3015_s20 + $0x20] sm:$0xff] }
  0x7f   : > { %v272_v36 = vrot.slane %v271_v28, 4  ;;  %v345_v63 = vadd.f32 %v339_v51, %v337_v50  ;;  %v391_v26 = vmul.f32 %v3106_v7, %v3106_v7 }
  0x80   : > { %v290_v42 = vrot.slane %v289_v33, 4  ;;  %v356_v53 = vadd.f32 %v355_v45, %v344_v37  ;;  %v409_v54 = vadd.f32 %v408_v47, %v396_v43 }
  0x81   : > { %v273_v44 = vadd.f32 %v272_v36, %v271_v28  ;;  %v346_v15 = vadd.f32 %v345_v63, %v341_v57  ;;  %v393_v28 = vmul.f32 %v3109_v13, %v3109_v13  ;;  %v395_v36 = vmul.f32 %v387_v19, %v387_v19 }
  0x82   : > { %v291_v49 = vadd.f32 %v290_v42, %v289_v33  ;;  %v357_v59 = vrot.slane %v356_v53, 4  ;;  %v410_v60 = vadd.f32 %v409_v54, %v398_v46  ;;  %v389_v33 = vld [vmem:[%s3015_s20 + $0x30] sm:$0xff]  ;;  %v3117_v54 = vld [vmem:[#allocation3 + $0x8] sm:$0xff] }
  0x83   : > { %v274_v52 = vrot.slane %v273_v44, 2  ;;  %v347_v23 = vadd.f32 %v346_v15, %v343_v62  ;;  %v397_v42 = vmul.f32 %v389_v33, %v389_v33  ;;  %v399_v43 = vadd.f32 %v393_v28, %v391_v26  ;;  %4235 = vst [vmem:[#allocation21_spill] sm:$0xff] %v3117_v54  ;;  %v3121_v62 = vld [vmem:[#allocation3 + $0x48] sm:$0xff]  ;;  %v3130_v15 = vld [vmem:[#allocation3 + $0x38] sm:$0xff] }
  0x84   : > { %v292_v56 = vrot.slane %v291_v49, 2  ;;  %v358_v5 = vadd.f32 %v357_v59, %v356_v53  ;;  %v411_v6 = vrot.slane %v410_v60, 4  ;;  %4237 = vst [vmem:[#allocation23_spill] sm:$0xff] %v3121_v62  ;;  %v254_v63 = vmul.f32 %v3117_v54, %v3117_v54  ;;  %4239 = vst [vmem:[#allocation25_spill] sm:$0xff] %v3130_v15 }
  0x85   : > { %v275_v58 = vadd.f32 %v274_v52, %v273_v44  ;;  %v348_v35 = vrot.slane %v347_v23, 4  ;;  %v400_v47 = vadd.f32 %v399_v43, %v395_v36  ;;  %v260_v33 = vmul.f32 %v3130_v15, %v3130_v15 }
  0x86   : > { %v293_v61 = vadd.f32 %v292_v56, %v291_v49  ;;  %v359_v17 = vrot.slane %v358_v5, 2  ;;  %v412_v18 = vadd.f32 %v411_v6, %v410_v60  ;;  %v3119_v56 = vld [vmem:[#allocation3 + $0x28] sm:$0xff] }
  0x87   : > { %v276_v0 = vrot.slane %v275_v58, 1  ;;  %v349_v39 = vadd.f32 %v348_v35, %v347_v23  ;;  %v401_v52 = vadd.f32 %v400_v47, %v397_v42  ;;  %4236 = vst [vmem:[#allocation22_spill] sm:$0xff] %v3119_v56  ;;  %v3140_v23 = vld [vmem:[#allocation3 + $0x78] sm:$0xff] }
  0x88   : > { %v294_v14 = vrot.slane %v293_v61, 1  ;;  %v360_v30 = vadd.f32 %v359_v17, %v358_v5  ;;  %v413_v32 = vrot.slane %v412_v18, 2  ;;  %v3133_v17 = vld [vmem:[#allocation3 + $0x68] sm:$0xff]  ;;  %4242 = vst [vmem:[#allocation28_spill] sm:$0xff] %v3140_v23 }
  0x89   : > { %v277_v16 = vadd.f32 %v276_v0, %v275_v58  ;;  %v350_v46 = vrot.slane %v349_v39, 2  ;;  %v402_v58 = vrot.slane %v401_v52, 4  ;;  %v258_v0 = vmul.f32 %v3119_v56, %v3119_v56  ;;  %4240 = vst [vmem:[#allocation26_spill] sm:$0xff] %v3133_v17 }
  0x8a   : > { %v295_v20 = vadd.f32 %v294_v14, %v293_v61  ;;  %v361_v37 = vrot.slane %v360_v30, 1  ;;  %v414_v38 = vadd.f32 %v413_v32, %v412_v18  ;;  %v3128_v14 = vld [vmem:[#allocation3 + $0x18] sm:$0xff] }
  0x8b   : > { %v305_v29 = vmax.f32 %v277_v16, 1e-16  ;;  %v351_v51 = vadd.f32 %v350_v46, %v349_v39  ;;  %v403_v60 = vadd.f32 %v402_v58, %v401_v52  ;;  %4238 = vst [vmem:[#allocation24_spill] sm:$0xff] %v3128_v14  ;;  %v3135_v18 = vld [vmem:[#allocation3 + $0x58] sm:$0xff]  ;;  %v256_v32 = vmul.f32 %v3128_v14, %v3128_v14 }
  0x8c   : > { %v307_v34 = vmax.f32 %v295_v20, 1e-16  ;;  %v362_v44 = vadd.f32 %v361_v37, %v360_v30  ;;  %v415_v45 = vrot.slane %v414_v38, 1  ;;  %4241 = vst [vmem:[#allocation27_spill] sm:$0xff] %v3135_v18  ;;  %v262_v20 = vmul.f32 %v3121_v62, %v3121_v62 }
  0x8d   : > { %2346 = vrsqrt.f32 %v305_v29  ;;  %v352_v57 = vrot.slane %v351_v51, 1  ;;  %v404_v28 = vrot.slane %v403_v60, 2  ;;  %v278_v30 = vadd.f32 %v258_v0, %v254_v63 }
  0x8e   : > { %2348 = vrsqrt.f32 %v307_v34  ;;  %v364_v49 = vmax.f32 %v362_v44, 1e-16  ;;  %v416_v50 = vadd.f32 %v415_v45, %v414_v38  ;;  %v266_v34 = vmul.f32 %v3133_v17, %v3133_v17 }
  0x8f   : > { %v353_v59 = vadd.f32 %v352_v57, %v351_v51  ;;  %v264_v35 = vmul.f32 %v3135_v18, %v3135_v18  ;;  %v268_v38 = vmul.f32 %v3140_v23, %v3140_v23  ;;  %v405_v39 = vadd.f32 %v404_v28, %v403_v60 }
  0x90   : > { %2350 = vrsqrt.f32 %v364_v49  ;;  %v418_v53 = vmax.f32 %v416_v50, 1e-16  ;;  %v279_v49 = vadd.f32 %v278_v30, %v262_v20  ;;  %v296_v50 = vadd.f32 %v260_v33, %v256_v32 }
  0x91   : > { %v363_v26 = vmax.f32 %v353_v59, 1e-16  ;;  %v406_v51 = vrot.slane %v405_v39, 1 }
  0x92   : > { %2352 = vrsqrt.f32 %v418_v53  ;;  %v280_v28 = vadd.f32 %v279_v49, %v266_v34 }
  0x93   : > { %2354 = vrsqrt.f32 %v363_v26 }
  0x97   : > { %v2347_v61 = vpop.eup %2346 }
  0x98   : > { %v2349_v5 = vpop.eup %2348  ;;  %v313_v6 = vmul.f32 %v2347_v61, %v3019_v1  ;;  %v317_v19 = vmul.f32 %v2347_v61, %v3021_v2  ;;  %v321_v37 = vmul.f32 %v2347_v61, %v3023_v3 }
  0x99   : > { %v315_v16 = vmul.f32 %v2349_v5, %v3033_v8  ;;  %v319_v29 = vmul.f32 %v2349_v5, %v3035_v9  ;;  %v323_v47 = vmul.f32 %v2349_v5, %v3039_v11 }
  0x9a   : > { %429 = vxpose.xlu0.b32.start [1/4] (short) %v313_v6, 128  ;;  %v2351_v36 = vpop.eup %2350  ;;  %v327_v6 = vmul.f32 %v2349_v5, %v3041_v12 }
  0x9b   : > { %493 = vxpose.xlu1.b32.start [1/4] (short) %v315_v16, 128  ;;  %v368_v42 = vmul.f32 %v2351_v36, %v3054_v21  ;;  %v370_v43 = vmul.f32 %v2351_v36, %v3057_v22  ;;  %v372_v44 = vmul.f32 %v2351_v36, %v3060_v24  ;;  %v374_v45 = vmul.f32 %v2351_v36, %v3063_v25 }
  0x9c   : > { %v3158_v46 = vpop.eup %2352  ;;  %v325_v22 = vmul.f32 %v2347_v61, %v3025_v4  ;;  %v407_v24 = vadd.f32 %v406_v51, %v405_v39  ;;  %v297_v16 = vadd.f32 %v296_v50, %v264_v35  ;;  %v281_v39 = vrot.slane %v280_v28, 4 }
  0x9d   : > { %v376_v52 = vmul.f32 2.0, %v368_v42  ;;  %v378_v53 = vmul.f32 2.0, %v370_v43  ;;  %v422_v57 = vmul.f32 %v3158_v46, %v3068_v27  ;;  %v424_v21 = vmul.f32 %v3158_v46, %v3075_v31  ;;  %v2355_v30 = vpop.eup %2354 }
  0x9e   : > { %430 = vxpose.xlu0.b32.cont [2/4] (short) %v317_v19, 128  ;;  %v3166_v25 = vmul.f32 2.0, %v372_v44  ;;  %v3168_v58 = vmul.f32 2.0, %v374_v45  ;;  %v417_v19 = vmax.f32 %v407_v24, 1e-16  ;;  %v298_v32 = vadd.f32 %v297_v16, %v268_v38 }
  0x9f   : > { %494 = vxpose.xlu1.b32.cont [2/4] (short) %v319_v29, 128  ;;  %v2258_v59 = vpack.c.bf16 %v378_v53, %v376_v52  ;;  %v1200_v60 = vmul.f32 %v376_v52, %v368_v42  ;;  %v1202_v63 = vmul.f32 %v378_v53, %v370_v43  ;;  %v1226_v0 = vmul.f32 %v422_v57, %v376_v52 }
  0xa0   : > { %4243 = vst [vmem:[#allocation29_spill] sm:$0xff] %v3166_v25  ;;  %4244 = vst [vmem:[#allocation30_spill] sm:$0xff] %v3168_v58  ;;  %v1228_v27 = vmul.f32 %v424_v21, %v378_v53  ;;  %v1204_v61 = vmul.f32 %v3166_v25, %v372_v44  ;;  %v1206_v20 = vmul.f32 %v3168_v58, %v374_v45  ;;  %2356 = vrsqrt.f32 %v417_v19 }
  0xa1   : > { %2259 = vmatprep.subr.bf16.mxu0 %v2258_v59  ;;  %v1216_v31 = vadd.f32 %v1202_v63, %v1200_v60  ;;  %2266 = vmatprep.subr.bf16.mxu1 %v2258_v59  ;;  %v367_v5 = vmul.f32 %v2355_v30, %v3086_v40  ;;  %v369_v33 = vmul.f32 %v2355_v30, %v3089_v41  ;;  %v299_v34 = vrot.slane %v298_v32, 4 }
  0xa2   : > { %431 = vxpose.xlu0.b32.cont [3/4] (short) %v321_v37, 128  ;;  %v3173_v26 = vadd.f32 %v1228_v27, %v1226_v0  ;;  %v371_v36 = vmul.f32 %v2355_v30, %v3092_v48  ;;  %v373_v37 = vmul.f32 %v2355_v30, %v3099_v55  ;;  %v2262_v45 = vpack.c.bf16 %v3168_v58, %v3166_v25 }
  0xa3   : > { %495 = vxpose.xlu1.b32.cont [3/4] (short) %v323_v47, 128  ;;  %v1217_v29 = vadd.f32 %v1216_v31, %v1204_v61  ;;  %v375_v42 = vmul.f32 2.0, %v367_v5  ;;  %v377_v43 = vmul.f32 2.0, %v369_v33  ;;  %v282_v50 = vadd.f32 %v281_v39, %v280_v28 }
  0xa4   : > { %4245 = vst [vmem:[#allocation31_spill] sm:$0xff] %v3173_v26  ;;  %v3181_v44 = vmul.f32 2.0, %v371_v36  ;;  %v3185_v38 = vmul.f32 2.0, %v373_v37  ;;  %v300_v53 = vadd.f32 %v299_v34, %v298_v32 }
  0xa5   : > { %v3177_v35 = vadd.f32 %v1217_v29, %v1206_v20  ;;  %v2260_v40 = vpack.c.bf16 %v377_v43, %v375_v42  ;;  %v1199_v47 = vmul.f32 %v375_v42, %v367_v5  ;;  %v1201_v41 = vmul.f32 %v377_v43, %v369_v33 }
  0xa6   : > { %432 = vxpose.xlu0.b32.end [4/4] (short) %v325_v22, 128  ;;  %4247 = vst [vmem:[#allocation33_spill] sm:$0xff] %v3181_v44  ;;  %4248 = vst [vmem:[#allocation34_spill] sm:$0xff] %v3185_v38  ;;  %v1203_v49 = vmul.f32 %v3181_v44, %v371_v36  ;;  %v1205_v48 = vmul.f32 %v3185_v38, %v373_v37  ;;  %v2264_v51 = vpack.c.bf16 %v3185_v38, %v3181_v44 }
  0xa7   : > { %496 = vxpose.xlu1.b32.end [4/4] (short) %v327_v6, 128  ;;  %4246 = vst [vmem:[#allocation32_spill] sm:$0xff] %v3177_v35  ;;  %2261 = vmatpush1.bf16.msra.mxu0 %v2260_v40  ;;  %v1207_v55 = vadd.f32 %v1201_v41, %v1199_v47  ;;  %v283_v24 = vrot.slane %v282_v50, 2  ;;  %v301_v63 = vrot.slane %v300_v53, 2 }
  0xa8   : > { %2268 = vmatpush1.bf16.msra.mxu1 %v2260_v40  ;;  %2263 = vmatprep.subr.bf16.mxu0 %v2262_v45 }
  0xa9   : > { %2267 = vmatprep.subr.bf16.mxu1 %v2262_v45  ;;  %v1208_v22 = vadd.f32 %v1207_v55, %v1203_v49  ;;  %v284_v16 = vadd.f32 %v283_v24, %v282_v50  ;;  %v302_v27 = vadd.f32 %v301_v63, %v300_v53 }
  0xaa   : > { %v3191_v52 = vpop.eup %2356 }
  0xab   : > { %4249 = vst [vmem:[#allocation35_spill] sm:$0xff] %v3191_v52  ;;  %v421_v57 = vmul.f32 %v3191_v52, %v3106_v7  ;;  %v423_v21 = vmul.f32 %v3191_v52, %v3109_v13  ;;  %2265 = vmatpush1.bf16.msra.mxu0 %v2264_v51  ;;  %v3197_v0 = vadd.f32 %v1208_v22, %v1205_v48  ;;  %v285_v19 = vrot.slane %v284_v16, 1 }
  0xac   : > { %2269 = vmatpush1.bf16.msra.mxu1 %v2264_v51  ;;  %v303_v31 = vrot.slane %v302_v27, 1 }
  0xad   : > { %v1225_v59 = vmul.f32 %v421_v57, %v375_v42  ;;  %v1227_v60 = vmul.f32 %v423_v21, %v377_v43  ;;  %4250 = vst [vmem:[#allocation36_spill] sm:$0xff] %v3197_v0  ;;  %v286_v61 = vadd.f32 %v285_v19, %v284_v16 }
  0xae   : > { %v304_v7 = vadd.f32 %v303_v31, %v302_v27 }
  0xaf   : > { %v3199_v6 = vadd.f32 %v1227_v60, %v1225_v59  ;;  %v306_v20 = vmax.f32 %v286_v61, 1e-16 }
  0xb0   : > { %v308_v28 = vmax.f32 %v304_v7, 1e-16 }
  0xb1   : > { %4251 = vst [vmem:[#allocation37_spill] sm:$0xff] %v3199_v6  ;;  %2358 = vrsqrt.f32 %v306_v20 }
  0xb2   : > { %2360 = vrsqrt.f32 %v308_v28 }
  0xbb   : > { %v2359_v13 = vpop.eup %2358 }
  0xbc   : > { %v2361_v29 = vpop.eup %2360  ;;  %v314_v30 = vmul.f32 %v2359_v13, %v3117_v54  ;;  %v318_v5 = vmul.f32 %v2359_v13, %v3119_v56  ;;  %v322_v36 = vmul.f32 %v2359_v13, %v3121_v62  ;;  %v326_v39 = vmul.f32 %v2359_v13, %v3133_v17 }
  0xbd   : > { %v316_v32 = vmul.f32 %v2361_v29, %v3128_v14  ;;  %v320_v33 = vmul.f32 %v2361_v29, %v3130_v15  ;;  %v324_v37 = vmul.f32 %v2361_v29, %v3135_v18  ;;  %v328_v42 = vmul.f32 %v2361_v29, %v3140_v23 }
  0xd7   : > { %461 = vxpose.xlu0.b32.start [1/4] (short) %v314_v30, 128 }
  0xd8   : > { %525 = vxpose.xlu1.b32.start [1/4] (short) %v316_v32, 128 }
  0xdb   : > { %462 = vxpose.xlu0.b32.cont [2/4] (short) %v318_v5, 128 }
  0xdc   : > { %526 = vxpose.xlu1.b32.cont [2/4] (short) %v320_v33, 128 }
  0xdf   : > { %463 = vxpose.xlu0.b32.cont [3/4] (short) %v322_v36, 128 }
  0xe0   : > { %527 = vxpose.xlu1.b32.cont [3/4] (short) %v324_v37, 128 }
  0xe3   : > { %464 = vxpose.xlu0.b32.end [4/4] (short) %v326_v39, 128 }
  0xe4   : > { %528 = vxpose.xlu1.b32.end [4/4] (short) %v328_v42, 128 }
 0x11a   : > { %v445_v43 = vpop.trf.xlu0 }
 0x11b   : > { %2187 = vmatmul.mubr.msk.f32.vlgmr.msra.gmra.mrb[0].mxu0 %vm557_vm1, %v445_v43  ;;  %v509_v34 = vpop.trf.xlu1 }
 0x11c   : > { %820 = vmatprep.mubr.f32.mxu0 %v2808_v10  ;;  %2219 = vmatmul.mubr.msk.f32.vlgmr.msra.gmra.mrb[0].mxu1 %vm557_vm1, %v509_v34 }
 0x11d   : > { %1012 = vmatprep.mubr.f32.mxu1 %v2808_v10 }
 0x11e   : > { %v446_v45 = vpop.trf.xlu0 }
 0x11f   : > { %2188 = vmatmul.mubr.msk.f32.gmra.mrb[2].mxu0 %vm557_vm1, %v446_v45  ;;  %v510_v40 = vpop.trf.xlu1 }
 0x120   : > { %826 = vmatprep.mubr.f32.mxu0 %v2808_v10  ;;  %2220 = vmatmul.mubr.msk.f32.gmra.mrb[2].mxu1 %vm557_vm1, %v510_v40 }
 0x121   : > { %1018 = vmatprep.mubr.f32.mxu1 %v2808_v10 }
 0x122   : > { %v447_v47 = vpop.trf.xlu0 }
 0x123   : > { %2189 = vmatmul.mubr.msk.f32.gmra.mrb[4].mxu0 %vm557_vm1, %v447_v47  ;;  %v511_v41 = vpop.trf.xlu1 }
 0x124   : > { %832 = vmatprep.mubr.f32.mxu0 %v2808_v10  ;;  %2221 = vmatmul.mubr.msk.f32.gmra.mrb[4].mxu1 %vm557_vm1, %v511_v41 }
 0x125   : > { %1024 = vmatprep.mubr.f32.mxu1 %v2808_v10 }
 0x126   : > { %v448_v49 = vpop.trf.xlu0 }
 0x127   : > { %2190 = vmatmul.mubr.msk.f32.gmra.mrb[6].mxu0 %vm557_vm1, %v448_v49  ;;  %v512_v48 = vpop.trf.xlu1 }
 0x128   : > { %838 = vmatprep.mubr.f32.mxu0 %v2808_v10  ;;  %2222 = vmatmul.mubr.msk.f32.gmra.mrb[6].mxu1 %vm557_vm1, %v512_v48 }
 0x129   : > { %1030 = vmatprep.mubr.f32.mxu1 %v2808_v10 }
 0x12a   : > { %v449_v50 = vpop.trf.xlu0 }
 0x12b   : > { %2191 = vmatmul.mubr.msk.f32.gmra.mrb[8].mxu0 %vm557_vm1, %v449_v50  ;;  %v513_v55 = vpop.trf.xlu1 }
 0x12c   : > { %844 = vmatprep.mubr.f32.mxu0 %v2808_v10  ;;  %2223 = vmatmul.mubr.msk.f32.gmra.mrb[8].mxu1 %vm557_vm1, %v513_v55 }
 0x12d   : > { %1036 = vmatprep.mubr.f32.mxu1 %v2808_v10 }
 0x12e   : > { %v450_v51 = vpop.trf.xlu0 }
 0x12f   : > { %2192 = vmatmul.mubr.msk.f32.gmra.mrb[10].mxu0 %vm557_vm1, %v450_v51  ;;  %v514_v53 = vpop.trf.xlu1 }
 0x130   : > { %850 = vmatprep.mubr.f32.mxu0 %v2808_v10  ;;  %2224 = vmatmul.mubr.msk.f32.gmra.mrb[10].mxu1 %vm557_vm1, %v514_v53 }
 0x131   : > { %1042 = vmatprep.mubr.f32.mxu1 %v2808_v10 }
 0x132   : > { %v451_v57 = vpop.trf.xlu0 }
 0x133   : > { %2193 = vmatmul.mubr.msk.f32.gmra.mrb[12].mxu0 %vm557_vm1, %v451_v57  ;;  %v515_v21 = vpop.trf.xlu1 }
 0x134   : > { %856 = vmatprep.mubr.f32.mxu0 %v2808_v10  ;;  %2225 = vmatmul.mubr.msk.f32.gmra.mrb[12].mxu1 %vm557_vm1, %v515_v21 }
 0x135   : > { %1048 = vmatprep.mubr.f32.mxu1 %v2808_v10 }
 0x136   : > { %v452_v22 = vpop.trf.xlu0 }
 0x137   : > { %2194 = vmatmul.mubr.msk.f32.gmra.mrb[14].mxu0 %vm557_vm1, %v452_v22  ;;  %v516_v24 = vpop.trf.xlu1 }
 0x138   : > { %862 = vmatprep.mubr.f32.mxu0 %v2808_v10  ;;  %2226 = vmatmul.mubr.msk.f32.gmra.mrb[14].mxu1 %vm557_vm1, %v516_v24 }
 0x139   : > { %1054 = vmatprep.mubr.f32.mxu1 %v2808_v10 }
 0x13a   : > { %v453_v59 = vpop.trf.xlu0 }
 0x13b   : > { %2195 = vmatmul.mubr.msk.f32.gmra.mrb[16].mxu0 %vm557_vm1, %v453_v59  ;;  %v517_v60 = vpop.trf.xlu1 }
 0x13c   : > { %868 = vmatprep.mubr.f32.mxu0 %v2808_v10  ;;  %2227 = vmatmul.mubr.msk.f32.gmra.mrb[16].mxu1 %vm557_vm1, %v517_v60 }
 0x13d   : > { %1060 = vmatprep.mubr.f32.mxu1 %v2808_v10 }
 0x13e   : > { %v454_v63 = vpop.trf.xlu0 }
 0x13f   : > { %2196 = vmatmul.mubr.msk.f32.gmra.mrb[18].mxu0 %vm557_vm1, %v454_v63  ;;  %v518_v16 = vpop.trf.xlu1 }
 0x140   : > { %874 = vmatprep.mubr.f32.mxu0 %v2808_v10  ;;  %2228 = vmatmul.mubr.msk.f32.gmra.mrb[18].mxu1 %vm557_vm1, %v518_v16 }
 0x141   : > { %1066 = vmatprep.mubr.f32.mxu1 %v2808_v10 }
 0x142   : > { %v455_v27 = vpop.trf.xlu0 }
 0x143   : > { %2197 = vmatmul.mubr.msk.f32.gmra.mrb[20].mxu0 %vm557_vm1, %v455_v27  ;;  %v519_v19 = vpop.trf.xlu1 }
 0x144   : > { %880 = vmatprep.mubr.f32.mxu0 %v2808_v10  ;;  %2229 = vmatmul.mubr.msk.f32.gmra.mrb[20].mxu1 %vm557_vm1, %v519_v19 }
 0x145   : > { %1072 = vmatprep.mubr.f32.mxu1 %v2808_v10 }
 0x146   : > { %v456_v31 = vpop.trf.xlu0 }
 0x147   : > { %2198 = vmatmul.mubr.msk.f32.gmra.mrb[22].mxu0 %vm557_vm1, %v456_v31  ;;  %v520_v61 = vpop.trf.xlu1 }
 0x148   : > { %886 = vmatprep.mubr.f32.mxu0 %v2808_v10  ;;  %2230 = vmatmul.mubr.msk.f32.gmra.mrb[22].mxu1 %vm557_vm1, %v520_v61 }
 0x149   : > { %1078 = vmatprep.mubr.f32.mxu1 %v2808_v10 }
 0x14a   : > { %v457_v7 = vpop.trf.xlu0 }
 0x14b   : > { %2199 = vmatmul.mubr.msk.f32.gmra.mrb[24].mxu0 %vm557_vm1, %v457_v7  ;;  %v521_v20 = vpop.trf.xlu1 }
 0x14c   : > { %892 = vmatprep.mubr.f32.mxu0 %v2808_v10  ;;  %2231 = vmatmul.mubr.msk.f32.gmra.mrb[24].mxu1 %vm557_vm1, %v521_v20 }
 0x14d   : > { %1084 = vmatprep.mubr.f32.mxu1 %v2808_v10 }
 0x14e   : > { %v458_v28 = vpop.trf.xlu0 }
 0x14f   : > { %2200 = vmatmul.mubr.msk.f32.gmra.mrb[26].mxu0 %vm557_vm1, %v458_v28  ;;  %v522_v13 = vpop.trf.xlu1 }
 0x150   : > { %898 = vmatprep.mubr.f32.mxu0 %v2808_v10  ;;  %2232 = vmatmul.mubr.msk.f32.gmra.mrb[26].mxu1 %vm557_vm1, %v522_v13 }
 0x151   : > { %1090 = vmatprep.mubr.f32.mxu1 %v2808_v10 }
 0x152   : > { %v459_v29 = vpop.trf.xlu0 }
 0x153   : > { %2201 = vmatmul.mubr.msk.f32.gmra.mrb[28].mxu0 %vm557_vm1, %v459_v29  ;;  %v523_v30 = vpop.trf.xlu1 }
 0x154   : > { %904 = vmatprep.mubr.f32.mxu0 %v2808_v10  ;;  %2233 = vmatmul.mubr.msk.f32.gmra.mrb[28].mxu1 %vm557_vm1, %v523_v30 }
 0x155   : > { %1096 = vmatprep.mubr.f32.mxu1 %v2808_v10 }
 0x156   : > { %v460_v32 = vpop.trf.xlu0 }
 0x157   : > { %2202 = vmatmul.mubr.msk.f32.gmra.mrb[30].mxu0 %vm557_vm1, %v460_v32  ;;  %v524_v5 = vpop.trf.xlu1 }
 0x158   : > { %910 = vmatprep.mubr.f32.mxu0 %v2808_v10  ;;  %2234 = vmatmul.mubr.msk.f32.gmra.mrb[30].mxu1 %vm557_vm1, %v524_v5 }
 0x159   : > { %1102 = vmatprep.mubr.f32.mxu1 %v2808_v10 }
 0x15a   : > { %v477_v33 = vpop.trf.xlu0 }
 0x15b   : > { %2203 = vmatmul.mubr.msk.f32.gmra.mrb[32].mxu0 %vm557_vm1, %v477_v33  ;;  %v541_v36 = vpop.trf.xlu1 }
 0x15c   : > { %916 = vmatprep.mubr.f32.mxu0 %v2808_v10  ;;  %2235 = vmatmul.mubr.msk.f32.gmra.mrb[32].mxu1 %vm557_vm1, %v541_v36 }
 0x15d   : > { %1108 = vmatprep.mubr.f32.mxu1 %v2808_v10 }
 0x15e   : > { %v478_v37 = vpop.trf.xlu0 }
 0x15f   : > { %2204 = vmatmul.mubr.msk.f32.gmra.mrb[34].mxu0 %vm557_vm1, %v478_v37  ;;  %v542_v39 = vpop.trf.xlu1 }
 0x160   : > { %922 = vmatprep.mubr.f32.mxu0 %v2808_v10  ;;  %2236 = vmatmul.mubr.msk.f32.gmra.mrb[34].mxu1 %vm557_vm1, %v542_v39 }
 0x161   : > { %1114 = vmatprep.mubr.f32.mxu1 %v2808_v10 }
 0x162   : > { %v479_v42 = vpop.trf.xlu0 }
 0x163   : > { %2205 = vmatmul.mubr.msk.f32.gmra.mrb[36].mxu0 %vm557_vm1, %v479_v42  ;;  %v543_v43 = vpop.trf.xlu1 }
 0x164   : > { %928 = vmatprep.mubr.f32.mxu0 %v2808_v10  ;;  %2237 = vmatmul.mubr.msk.f32.gmra.mrb[36].mxu1 %vm557_vm1, %v543_v43 }
 0x165   : > { %1120 = vmatprep.mubr.f32.mxu1 %v2808_v10 }
 0x166   : > { %v480_v34 = vpop.trf.xlu0 }
 0x167   : > { %2206 = vmatmul.mubr.msk.f32.gmra.mrb[38].mxu0 %vm557_vm1, %v480_v34  ;;  %v544_v45 = vpop.trf.xlu1 }
 0x168   : > { %934 = vmatprep.mubr.f32.mxu0 %v2808_v10  ;;  %2238 = vmatmul.mubr.msk.f32.gmra.mrb[38].mxu1 %vm557_vm1, %v544_v45 }
 0x169   : > { %1126 = vmatprep.mubr.f32.mxu1 %v2808_v10 }
 0x16a   : > { %v481_v40 = vpop.trf.xlu0 }
 0x16b   : > { %2207 = vmatmul.mubr.msk.f32.gmra.mrb[40].mxu0 %vm557_vm1, %v481_v40  ;;  %v545_v47 = vpop.trf.xlu1 }
 0x16c   : > { %940 = vmatprep.mubr.f32.mxu0 %v2808_v10  ;;  %2239 = vmatmul.mubr.msk.f32.gmra.mrb[40].mxu1 %vm557_vm1, %v545_v47 }
 0x16d   : > { %1132 = vmatprep.mubr.f32.mxu1 %v2808_v10 }
 0x16e   : > { %v482_v41 = vpop.trf.xlu0 }
 0x16f   : > { %2208 = vmatmul.mubr.msk.f32.gmra.mrb[42].mxu0 %vm557_vm1, %v482_v41  ;;  %v546_v49 = vpop.trf.xlu1 }
 0x170   : > { %946 = vmatprep.mubr.f32.mxu0 %v2808_v10  ;;  %2240 = vmatmul.mubr.msk.f32.gmra.mrb[42].mxu1 %vm557_vm1, %v546_v49 }
 0x171   : > { %1138 = vmatprep.mubr.f32.mxu1 %v2808_v10 }
 0x172   : > { %v483_v48 = vpop.trf.xlu0 }
 0x173   : > { %2209 = vmatmul.mubr.msk.f32.gmra.mrb[44].mxu0 %vm557_vm1, %v483_v48  ;;  %v547_v50 = vpop.trf.xlu1 }
 0x174   : > { %952 = vmatprep.mubr.f32.mxu0 %v2808_v10  ;;  %2241 = vmatmul.mubr.msk.f32.gmra.mrb[44].mxu1 %vm557_vm1, %v547_v50 }
 0x175   : > { %1144 = vmatprep.mubr.f32.mxu1 %v2808_v10 }
 0x176   : > { %v484_v55 = vpop.trf.xlu0 }
 0x177   : > { %2210 = vmatmul.mubr.msk.f32.gmra.mrb[46].mxu0 %vm557_vm1, %v484_v55  ;;  %v548_v51 = vpop.trf.xlu1 }
 0x178   : > { %958 = vmatprep.mubr.f32.mxu0 %v2808_v10  ;;  %2242 = vmatmul.mubr.msk.f32.gmra.mrb[46].mxu1 %vm557_vm1, %v548_v51 }
 0x179   : > { %1150 = vmatprep.mubr.f32.mxu1 %v2808_v10 }
 0x17a   : > { %v485_v53 = vpop.trf.xlu0 }
 0x17b   : > { %2211 = vmatmul.mubr.msk.f32.gmra.mrb[48].mxu0 %vm557_vm1, %v485_v53  ;;  %v549_v57 = vpop.trf.xlu1 }
 0x17c   : > { %964 = vmatprep.mubr.f32.mxu0 %v2808_v10  ;;  %2243 = vmatmul.mubr.msk.f32.gmra.mrb[48].mxu1 %vm557_vm1, %v549_v57 }
 0x17d   : > { %1156 = vmatprep.mubr.f32.mxu1 %v2808_v10 }
 0x17e   : > { %v486_v21 = vpop.trf.xlu0 }
 0x17f   : > { %2212 = vmatmul.mubr.msk.f32.gmra.mrb[50].mxu0 %vm557_vm1, %v486_v21  ;;  %v550_v22 = vpop.trf.xlu1 }
 0x180   : > { %970 = vmatprep.mubr.f32.mxu0 %v2808_v10  ;;  %2244 = vmatmul.mubr.msk.f32.gmra.mrb[50].mxu1 %vm557_vm1, %v550_v22 }
 0x181   : > { %1162 = vmatprep.mubr.f32.mxu1 %v2808_v10 }
 0x182   : > { %v487_v24 = vpop.trf.xlu0 }
 0x183   : > { %2213 = vmatmul.mubr.msk.f32.gmra.mrb[52].mxu0 %vm557_vm1, %v487_v24  ;;  %v551_v59 = vpop.trf.xlu1 }
 0x184   : > { %976 = vmatprep.mubr.f32.mxu0 %v2808_v10  ;;  %2245 = vmatmul.mubr.msk.f32.gmra.mrb[52].mxu1 %vm557_vm1, %v551_v59 }
 0x185   : > { %1168 = vmatprep.mubr.f32.mxu1 %v2808_v10 }
 0x186   : > { %v488_v60 = vpop.trf.xlu0 }
 0x187   : > { %2214 = vmatmul.mubr.msk.f32.gmra.mrb[54].mxu0 %vm557_vm1, %v488_v60  ;;  %v552_v63 = vpop.trf.xlu1 }
 0x188   : > { %982 = vmatprep.mubr.f32.mxu0 %v2808_v10  ;;  %2246 = vmatmul.mubr.msk.f32.gmra.mrb[54].mxu1 %vm557_vm1, %v552_v63 }
 0x189   : > { %1174 = vmatprep.mubr.f32.mxu1 %v2808_v10 }
 0x18a   : > { %v489_v16 = vpop.trf.xlu0 }
 0x18b   : > { %2215 = vmatmul.mubr.msk.f32.gmra.mrb[56].mxu0 %vm557_vm1, %v489_v16  ;;  %v553_v27 = vpop.trf.xlu1 }
 0x18c   : > { %988 = vmatprep.mubr.f32.mxu0 %v2808_v10  ;;  %2247 = vmatmul.mubr.msk.f32.gmra.mrb[56].mxu1 %vm557_vm1, %v553_v27 }
 0x18d   : > { %1180 = vmatprep.mubr.f32.mxu1 %v2808_v10 }
 0x18e   : > { %v490_v19 = vpop.trf.xlu0 }
 0x18f   : > { %2216 = vmatmul.mubr.msk.f32.gmra.mrb[58].mxu0 %vm557_vm1, %v490_v19  ;;  %v554_v31 = vpop.trf.xlu1 }
 0x190   : > { %994 = vmatprep.mubr.f32.mxu0 %v2808_v10  ;;  %2248 = vmatmul.mubr.msk.f32.gmra.mrb[58].mxu1 %vm557_vm1, %v554_v31 }
 0x191   : > { %1186 = vmatprep.mubr.f32.mxu1 %v2808_v10 }
 0x192   : > { %v491_v61 = vpop.trf.xlu0 }
 0x193   : > { %2217 = vmatmul.mubr.msk.f32.gmra.mrb[60].mxu0 %vm557_vm1, %v491_v61  ;;  %v555_v7 = vpop.trf.xlu1 }
 0x194   : > { %1000 = vmatprep.mubr.f32.mxu0 %v2808_v10  ;;  %2249 = vmatmul.mubr.msk.f32.gmra.mrb[60].mxu1 %vm557_vm1, %v555_v7 }
 0x195   : > { %1192 = vmatprep.mubr.f32.mxu1 %v2808_v10 }
 0x196   : > { %v492_v20 = vpop.trf.xlu0 }
 0x197   : > { %2218 = vmatmul.mubr.msk.f32.gmra.mrb[62].mxu0 %vm557_vm1, %v492_v20  ;;  %v556_v28 = vpop.trf.xlu1 }
 0x198   : > { %2250 = vmatmul.mubr.msk.f32.gmra.mrb[62].mxu1 %vm557_vm1, %v556_v28 }
 0x1ee   : > { %v3335_v13 = vpop.f32.mrb[0].mxu0 }
 0x1ef   : > { %v3337_v29 = vpop.f32.mrb[1].mxu0  ;;  %v3339_v30 = vpop.f32.mrb[0].mxu1 }
 0x1f0   : > { %4252 = vst [vmem:[#allocation38_spill] sm:$0xff] %v3337_v29  ;;  %4253 = vst [vmem:[#allocation39_spill] sm:$0xff] %v3339_v30  ;;  %v3341_v32 = vpop.f32.mrb[1].mxu1 }
 0x1f1   : > { %4254 = vst [vmem:[#allocation40_spill] sm:$0xff] %v3341_v32 }
 0x1f2   : > { %v3343_v5 = vpop.f32.mrb[2].mxu0 }
 0x1f3   : > { %v3345_v33 = vpop.f32.mrb[3].mxu0  ;;  %v3347_v36 = vpop.f32.mrb[2].mxu1 }
 0x1f4   : > { %4255 = vst [vmem:[#allocation41_spill] sm:$0xff] %v3345_v33  ;;  %4256 = vst [vmem:[#allocation42_spill] sm:$0xff] %v3347_v36  ;;  %v1281_v10 = vmax.f32 %v3347_v36, %v3339_v30  ;;  %v3351_v37 = vpop.f32.mrb[3].mxu1 }
 0x1f5   : > { %4257 = vst [vmem:[#allocation43_spill] sm:$0xff] %v3351_v37  ;;  %v1350_v39 = vmax.f32 %v3351_v37, %v3341_v32 }
 0x1f6   : > { %v3355_v42 = vpop.f32.mrb[4].mxu0 }
 0x1f7   : > { %v1251_v43 = vmax.f32 %v3335_v13, %v3355_v42  ;;  %v3359_v34 = vpop.f32.mrb[5].mxu0  ;;  %v3361_v45 = vpop.f32.mrb[4].mxu1 }
 0x1f8   : > { %4258 = vst [vmem:[#allocation44_spill] sm:$0xff] %v3359_v34  ;;  %4259 = vst [vmem:[#allocation45_spill] sm:$0xff] %v3361_v45  ;;  %v1320_v40 = vmax.f32 %v3337_v29, %v3359_v34  ;;  %v1283_v47 = vmax.f32 %v1281_v10, %v3361_v45  ;;  %v3366_v41 = vpop.f32.mrb[5].mxu1 }
 0x1f9   : > { %4260 = vst [vmem:[#allocation46_spill] sm:$0xff] %v3366_v41  ;;  %v1352_v49 = vmax.f32 %v1350_v39, %v3366_v41 }
 0x1fa   : > { %v3369_v48 = vpop.f32.mrb[6].mxu0 }
 0x1fb   : > { %v1252_v50 = vmax.f32 %v3343_v5, %v3369_v48  ;;  %v3373_v55 = vpop.f32.mrb[7].mxu0  ;;  %v3375_v51 = vpop.f32.mrb[6].mxu1 }
 0x1fc   : > { %4261 = vst [vmem:[#allocation47_spill] sm:$0xff] %v3373_v55  ;;  %4262 = vst [vmem:[#allocation48_spill] sm:$0xff] %v3375_v51  ;;  %v1321_v53 = vmax.f32 %v3345_v33, %v3373_v55  ;;  %v1285_v57 = vmax.f32 %v1283_v47, %v3375_v51  ;;  %v3380_v21 = vpop.f32.mrb[7].mxu1 }
 0x1fd   : > { %4263 = vst [vmem:[#allocation49_spill] sm:$0xff] %v3380_v21  ;;  %v1354_v22 = vmax.f32 %v1352_v49, %v3380_v21 }
 0x1fe   : > { %v3383_v24 = vpop.f32.mrb[8].mxu0 }
 0x1ff   : > { %v1253_v59 = vmax.f32 %v1251_v43, %v3383_v24  ;;  %v3386_v60 = vpop.f32.mrb[9].mxu0  ;;  %v3388_v63 = vpop.f32.mrb[8].mxu1 }
 0x200   : > { %4264 = vst [vmem:[#allocation50_spill] sm:$0xff] %v3386_v60  ;;  %4265 = vst [vmem:[#allocation51_spill] sm:$0xff] %v3388_v63  ;;  %v1322_v16 = vmax.f32 %v1320_v40, %v3386_v60  ;;  %v1287_v27 = vmax.f32 %v1285_v57, %v3388_v63  ;;  %v3392_v19 = vpop.f32.mrb[9].mxu1 }
 0x201   : > { %4266 = vst [vmem:[#allocation52_spill] sm:$0xff] %v3392_v19  ;;  %v1356_v31 = vmax.f32 %v1354_v22, %v3392_v19 }
 0x202   : > { %v3395_v61 = vpop.f32.mrb[10].mxu0 }
 0x203   : > { %v1254_v7 = vmax.f32 %v1252_v50, %v3395_v61  ;;  %v3398_v20 = vpop.f32.mrb[11].mxu0  ;;  %v3400_v28 = vpop.f32.mrb[10].mxu1 }
 0x204   : > { %4267 = vst [vmem:[#allocation53_spill] sm:$0xff] %v3398_v20  ;;  %4268 = vst [vmem:[#allocation54_spill] sm:$0xff] %v3400_v28  ;;  %v1323_v10 = vmax.f32 %v1321_v53, %v3398_v20  ;;  %v1289_v39 = vmax.f32 %v1287_v27, %v3400_v28  ;;  %v3404_v43 = vpop.f32.mrb[11].mxu1 }
 0x205   : > { %4269 = vst [vmem:[#allocation55_spill] sm:$0xff] %v3404_v43  ;;  %v1358_v40 = vmax.f32 %v1356_v31, %v3404_v43 }
 0x206   : > { %v3407_v47 = vpop.f32.mrb[12].mxu0 }
 0x207   : > { %v1255_v49 = vmax.f32 %v1253_v59, %v3407_v47  ;;  %v3410_v57 = vpop.f32.mrb[13].mxu0  ;;  %v3412_v22 = vpop.f32.mrb[12].mxu1 }
 0x208   : > { %4270 = vst [vmem:[#allocation56_spill] sm:$0xff] %v3410_v57  ;;  %4271 = vst [vmem:[#allocation57_spill] sm:$0xff] %v3412_v22  ;;  %v1324_v50 = vmax.f32 %v1322_v16, %v3410_v57  ;;  %v1291_v23 = vmax.f32 %v1289_v39, %v3412_v22  ;;  %v3416_v12 = vpop.f32.mrb[13].mxu1 }
 0x209   : > { %4272 = vst [vmem:[#allocation58_spill] sm:$0xff] %v3416_v12  ;;  %v1360_v53 = vmax.f32 %v1358_v40, %v3416_v12 }
 0x20a   : > { %v3419_v27 = vpop.f32.mrb[14].mxu0 }
 0x20b   : > { %v1256_v31 = vmax.f32 %v1254_v7, %v3419_v27  ;;  %v3422_v17 = vpop.f32.mrb[15].mxu0  ;;  %v3424_v4 = vpop.f32.mrb[14].mxu1 }
 0x20c   : > { %4273 = vst [vmem:[#allocation59_spill] sm:$0xff] %v3422_v17  ;;  %4274 = vst [vmem:[#allocation60_spill] sm:$0xff] %v3424_v4  ;;  %v1325_v59 = vmax.f32 %v1323_v10, %v3422_v17  ;;  %v1282_v18 = vmax.f32 %v3424_v4, %v1291_v23  ;;  %v3428_v11 = vpop.f32.mrb[15].mxu1 }
 0x20d   : > { %4275 = vst [vmem:[#allocation61_spill] sm:$0xff] %v3428_v11  ;;  %v1351_v16 = vmax.f32 %v3428_v11, %v1360_v53 }
 0x20e   : > { %v3431_v39 = vpop.f32.mrb[16].mxu0 }
 0x20f   : > { %v1257_v40 = vmax.f32 %v1255_v49, %v3431_v39  ;;  %v3434_v62 = vpop.f32.mrb[17].mxu0  ;;  %v3436_v3 = vpop.f32.mrb[16].mxu1 }
 0x210   : > { %4276 = vst [vmem:[#allocation62_spill] sm:$0xff] %v3434_v62  ;;  %4277 = vst [vmem:[#allocation63_spill] sm:$0xff] %v3436_v3  ;;  %v1326_v7 = vmax.f32 %v1324_v50, %v3434_v62  ;;  %v1284_v15 = vmax.f32 %v1282_v18, %v3436_v3  ;;  %v3440_v14 = vpop.f32.mrb[17].mxu1 }
 0x211   : > { %4278 = vst [vmem:[#allocation64_spill] sm:$0xff] %v3440_v14  ;;  %v1353_v23 = vmax.f32 %v1351_v16, %v3440_v14 }
 0x212   : > { %v3443_v10 = vpop.f32.mrb[18].mxu0 }
 0x213   : > { %v1258_v53 = vmax.f32 %v1256_v31, %v3443_v10  ;;  %v3446_v9 = vpop.f32.mrb[19].mxu0  ;;  %v3448_v8 = vpop.f32.mrb[18].mxu1 }
 0x214   : > { %4279 = vst [vmem:[#allocation65_spill] sm:$0xff] %v3446_v9  ;;  %4280 = vst [vmem:[#allocation66_spill] sm:$0xff] %v3448_v8  ;;  %v1327_v49 = vmax.f32 %v1325_v59, %v3446_v9  ;;  %v1286_v56 = vmax.f32 %v1284_v15, %v3448_v8  ;;  %v3452_v54 = vpop.f32.mrb[19].mxu1 }
 0x215   : > { %4281 = vst [vmem:[#allocation67_spill] sm:$0xff] %v3452_v54  ;;  %v1355_v18 = vmax.f32 %v1353_v23, %v3452_v54 }
 0x216   : > { %v3455_v50 = vpop.f32.mrb[20].mxu0 }
 0x217   : > { %v1259_v16 = vmax.f32 %v1257_v40, %v3455_v50  ;;  %v3458_v2 = vpop.f32.mrb[21].mxu0  ;;  %v3460_v1 = vpop.f32.mrb[20].mxu1 }
 0x218   : > { %4282 = vst [vmem:[#allocation68_spill] sm:$0xff] %v3458_v2  ;;  %4283 = vst [vmem:[#allocation69_spill] sm:$0xff] %v3460_v1  ;;  %v1328_v31 = vmax.f32 %v1326_v7, %v3458_v2  ;;  %v1288_v35 = vmax.f32 %v1286_v56, %v3460_v1  ;;  %v3464_v14 = vpop.f32.mrb[21].mxu1 }
 0x219   : > { %4284 = vst [vmem:[#allocation70_spill] sm:$0xff] %v3464_v14  ;;  %v1357_v15 = vmax.f32 %v1355_v18, %v3464_v14 }
 0x21a   : > { %v3467_v59 = vpop.f32.mrb[22].mxu0 }
 0x21b   : > { %v1260_v23 = vmax.f32 %v1258_v53, %v3467_v59  ;;  %v3470_v54 = vpop.f32.mrb[23].mxu0  ;;  %v3472_v11 = vpop.f32.mrb[22].mxu1 }
 0x21c   : > { %4285 = vst [vmem:[#allocation71_spill] sm:$0xff] %v3470_v54  ;;  %4286 = vst [vmem:[#allocation72_spill] sm:$0xff] %v3472_v11  ;;  %v1329_v40 = vmax.f32 %v1327_v49, %v3470_v54  ;;  %v1290_v12 = vmax.f32 %v1288_v35, %v3472_v11  ;;  %v3476_v43 = vpop.f32.mrb[23].mxu1 }
 0x21d   : > { %4287 = vst [vmem:[#allocation73_spill] sm:$0xff] %v3476_v43  ;;  %v1359_v56 = vmax.f32 %v1357_v15, %v3476_v43 }
 0x21e   : > { %v3479_v7 = vpop.f32.mrb[24].mxu0 }
 0x21f   : > { %v1261_v18 = vmax.f32 %v1259_v16, %v3479_v7  ;;  %v3482_v14 = vpop.f32.mrb[25].mxu0  ;;  %v3484_v19 = vpop.f32.mrb[24].mxu1 }
 0x220   : > { %4288 = vst [vmem:[#allocation74_spill] sm:$0xff] %v3482_v14  ;;  %4289 = vst [vmem:[#allocation75_spill] sm:$0xff] %v3484_v19  ;;  %v1330_v53 = vmax.f32 %v1328_v31, %v3482_v14  ;;  %v1292_v21 = vmax.f32 %v1290_v12, %v3484_v19  ;;  %v3488_v41 = vpop.f32.mrb[25].mxu1 }
 0x221   : > { %4290 = vst [vmem:[#allocation76_spill] sm:$0xff] %v3488_v41  ;;  %v1361_v35 = vmax.f32 %v1359_v56, %v3488_v41 }
 0x222   : > { %v3491_v49 = vpop.f32.mrb[26].mxu0 }
 0x223   : > { %v1262_v15 = vmax.f32 %v1260_v23, %v3491_v49  ;;  %v3494_v43 = vpop.f32.mrb[27].mxu0  ;;  %v3496_v37 = vpop.f32.mrb[26].mxu1 }
 0x224   : > { %4291 = vst [vmem:[#allocation77_spill] sm:$0xff] %v3494_v43  ;;  %4292 = vst [vmem:[#allocation78_spill] sm:$0xff] %v3496_v37  ;;  %v1331_v16 = vmax.f32 %v1329_v40, %v3494_v43  ;;  %v1293_v32 = vmax.f32 %v3496_v37, %v1292_v21  ;;  %v3500_v11 = vpop.f32.mrb[27].mxu1 }
 0x225   : > { %4293 = vst [vmem:[#allocation79_spill] sm:$0xff] %v3500_v11  ;;  %v1362_v12 = vmax.f32 %v3500_v11, %v1361_v35 }
 0x226   : > { %v3503_v31 = vpop.f32.mrb[28].mxu0 }
 0x227   : > { %v1263_v56 = vmax.f32 %v1261_v18, %v3503_v31  ;;  %v3506_v41 = vpop.f32.mrb[29].mxu0  ;;  %v3508_v19 = vpop.f32.mrb[28].mxu1 }
 0x228   : > { %4294 = vst [vmem:[#allocation80_spill] sm:$0xff] %v3506_v41  ;;  %4295 = vst [vmem:[#allocation81_spill] sm:$0xff] %v3508_v19  ;;  %v1332_v23 = vmax.f32 %v1330_v53, %v3506_v41  ;;  %v1295_v1 = vmax.f32 %v1293_v32, %v3508_v19  ;;  %v3512_v14 = vpop.f32.mrb[29].mxu1 }
 0x229   : > { %4296 = vst [vmem:[#allocation82_spill] sm:$0xff] %v3512_v14  ;;  %v1364_v21 = vmax.f32 %v1362_v12, %v3512_v14 }
 0x22a   : > { %v3515_v40 = vpop.f32.mrb[30].mxu0 }
 0x22b   : > { %v1264_v35 = vmax.f32 %v1262_v15, %v3515_v40  ;;  %v3518_v11 = vpop.f32.mrb[31].mxu0  ;;  %v3520_v37 = vpop.f32.mrb[30].mxu1 }
 0x22c   : > { %4297 = vst [vmem:[#allocation83_spill] sm:$0xff] %v3518_v11  ;;  %4298 = vst [vmem:[#allocation84_spill] sm:$0xff] %v3520_v37  ;;  %v1333_v18 = vmax.f32 %v1331_v16, %v3518_v11  ;;  %v1297_v43 = vmax.f32 %v1295_v1, %v3520_v37  ;;  %v3524_v26 = vpop.f32.mrb[31].mxu1 }
 0x22d   : > { %4299 = vst [vmem:[#allocation85_spill] sm:$0xff] %v3524_v26  ;;  %v1366_v32 = vmax.f32 %v1364_v21, %v3524_v26 }
 0x22e   : > { %v3527_v53 = vpop.f32.mrb[32].mxu0 }
 0x22f   : > { %v1265_v12 = vmax.f32 %v1263_v56, %v3527_v53  ;;  %v3530_v14 = vpop.f32.mrb[33].mxu0  ;;  %v3532_v19 = vpop.f32.mrb[32].mxu1 }
 0x230   : > { %4300 = vst [vmem:[#allocation86_spill] sm:$0xff] %v3530_v14  ;;  %4301 = vst [vmem:[#allocation87_spill] sm:$0xff] %v3532_v19  ;;  %v1334_v15 = vmax.f32 %v1332_v23, %v3530_v14  ;;  %v1299_v41 = vmax.f32 %v1297_v43, %v3532_v19  ;;  %v3536_v6 = vpop.f32.mrb[33].mxu1 }
 0x231   : > { %4302 = vst [vmem:[#allocation88_spill] sm:$0xff] %v3536_v6  ;;  %v1368_v1 = vmax.f32 %v1366_v32, %v3536_v6 }
 0x232   : > { %v3539_v16 = vpop.f32.mrb[34].mxu0 }
 0x233   : > { %v1266_v21 = vmax.f32 %v1264_v35, %v3539_v16  ;;  %v3542_v26 = vpop.f32.mrb[35].mxu0  ;;  %v3544_v37 = vpop.f32.mrb[34].mxu1 }
 0x234   : > { %4303 = vst [vmem:[#allocation89_spill] sm:$0xff] %v3542_v26  ;;  %4304 = vst [vmem:[#allocation90_spill] sm:$0xff] %v3544_v37  ;;  %v1335_v56 = vmax.f32 %v1333_v18, %v3542_v26  ;;  %v1301_v11 = vmax.f32 %v1299_v41, %v3544_v37  ;;  %v3548_v54 = vpop.f32.mrb[35].mxu1 }
 0x235   : > { %4305 = vst [vmem:[#allocation91_spill] sm:$0xff] %v3548_v54  ;;  %v1370_v43 = vmax.f32 %v1368_v1, %v3548_v54 }
 0x236   : > { %v3551_v23 = vpop.f32.mrb[36].mxu0 }
 0x237   : > { %v1267_v32 = vmax.f32 %v1265_v12, %v3551_v23  ;;  %v3554_v6 = vpop.f32.mrb[37].mxu0  ;;  %v3556_v19 = vpop.f32.mrb[36].mxu1 }
 0x238   : > { %4306 = vst [vmem:[#allocation92_spill] sm:$0xff] %v3554_v6  ;;  %4307 = vst [vmem:[#allocation93_spill] sm:$0xff] %v3556_v19  ;;  %v1336_v35 = vmax.f32 %v1334_v15, %v3554_v6  ;;  %v1303_v14 = vmax.f32 %v1301_v11, %v3556_v19  ;;  %v3560_v2 = vpop.f32.mrb[37].mxu1 }
 0x239   : > { %4308 = vst [vmem:[#allocation94_spill] sm:$0xff] %v3560_v2  ;;  %v1372_v41 = vmax.f32 %v1370_v43, %v3560_v2 }
 0x23a   : > { %v3563_v18 = vpop.f32.mrb[38].mxu0 }
 0x23b   : > { %v1268_v1 = vmax.f32 %v1266_v21, %v3563_v18  ;;  %v3566_v54 = vpop.f32.mrb[39].mxu0  ;;  %v3568_v37 = vpop.f32.mrb[38].mxu1 }
 0x23c   : > { %4309 = vst [vmem:[#allocation95_spill] sm:$0xff] %v3566_v54  ;;  %4310 = vst [vmem:[#allocation96_spill] sm:$0xff] %v3568_v37  ;;  %v1337_v12 = vmax.f32 %v1335_v56, %v3566_v54  ;;  %v1305_v26 = vmax.f32 %v1303_v14, %v3568_v37  ;;  %v3572_v8 = vpop.f32.mrb[39].mxu1 }
 0x23d   : > { %4311 = vst [vmem:[#allocation97_spill] sm:$0xff] %v3572_v8  ;;  %v1374_v11 = vmax.f32 %v1372_v41, %v3572_v8 }
 0x23e   : > { %v3575_v15 = vpop.f32.mrb[40].mxu0 }
 0x23f   : > { %v1269_v43 = vmax.f32 %v1267_v32, %v3575_v15  ;;  %v3578_v2 = vpop.f32.mrb[41].mxu0  ;;  %v3580_v19 = vpop.f32.mrb[40].mxu1 }
 0x240   : > { %4312 = vst [vmem:[#allocation98_spill] sm:$0xff] %v3578_v2  ;;  %4313 = vst [vmem:[#allocation99_spill] sm:$0xff] %v3580_v19  ;;  %v1338_v21 = vmax.f32 %v1336_v35, %v3578_v2  ;;  %v1294_v6 = vmax.f32 %v3580_v19, %v1305_v26  ;;  %v3584_v9 = vpop.f32.mrb[41].mxu1 }
 0x241   : > { %4314 = vst [vmem:[#allocation100_spill] sm:$0xff] %v3584_v9  ;;  %v1363_v14 = vmax.f32 %v3584_v9, %v1374_v11 }
 0x242   : > { %v3587_v56 = vpop.f32.mrb[42].mxu0 }
 0x243   : > { %v1270_v41 = vmax.f32 %v1268_v1, %v3587_v56  ;;  %v3590_v8 = vpop.f32.mrb[43].mxu0  ;;  %v3592_v37 = vpop.f32.mrb[42].mxu1 }
 0x244   : > { %4315 = vst [vmem:[#allocation101_spill] sm:$0xff] %v3590_v8  ;;  %4316 = vst [vmem:[#allocation102_spill] sm:$0xff] %v3592_v37  ;;  %v1339_v32 = vmax.f32 %v1337_v12, %v3590_v8  ;;  %v1296_v54 = vmax.f32 %v1294_v6, %v3592_v37  ;;  %v3596_v3 = vpop.f32.mrb[43].mxu1 }
 0x245   : > { %4317 = vst [vmem:[#allocation103_spill] sm:$0xff] %v3596_v3  ;;  %v1365_v26 = vmax.f32 %v1363_v14, %v3596_v3 }
 0x246   : > { %v3599_v35 = vpop.f32.mrb[44].mxu0 }
 0x247   : > { %v1271_v11 = vmax.f32 %v1269_v43, %v3599_v35  ;;  %v3602_v9 = vpop.f32.mrb[45].mxu0  ;;  %v3604_v19 = vpop.f32.mrb[44].mxu1 }
 0x248   : > { %4318 = vst [vmem:[#allocation104_spill] sm:$0xff] %v3602_v9  ;;  %4319 = vst [vmem:[#allocation105_spill] sm:$0xff] %v3604_v19  ;;  %v1340_v1 = vmax.f32 %v1338_v21, %v3602_v9  ;;  %v1298_v2 = vmax.f32 %v1296_v54, %v3604_v19  ;;  %v3608_v4 = vpop.f32.mrb[45].mxu1 }
 0x249   : > { %4320 = vst [vmem:[#allocation106_spill] sm:$0xff] %v3608_v4  ;;  %v1367_v6 = vmax.f32 %v1365_v26, %v3608_v4 }
 0x24a   : > { %v3611_v12 = vpop.f32.mrb[46].mxu0 }
 0x24b   : > { %v1272_v14 = vmax.f32 %v1270_v41, %v3611_v12  ;;  %v3614_v3 = vpop.f32.mrb[47].mxu0  ;;  %v3616_v37 = vpop.f32.mrb[46].mxu1 }
 0x24c   : > { %4321 = vst [vmem:[#allocation107_spill] sm:$0xff] %v3614_v3  ;;  %v1341_v43 = vmax.f32 %v1339_v32, %v3614_v3  ;;  %v3619_v8 = vpop.f32.mrb[47].mxu1 }
 0x24d   : > { %4322 = vst [vmem:[#allocation108_spill] sm:$0xff] %v3619_v8 }
 0x24e   : > { %v3621_v62 = vpop.f32.mrb[48].mxu0 }
 0x24f   : > { %v1273_v54 = vmax.f32 %v1271_v11, %v3621_v62  ;;  %v3624_v21 = vpop.f32.mrb[49].mxu0  ;;  %v3626_v19 = vpop.f32.mrb[48].mxu1 }
 0x250   : > { %4323 = vst [vmem:[#allocation109_spill] sm:$0xff] %v3624_v21  ;;  %v1342_v26 = vmax.f32 %v1340_v1, %v3624_v21  ;;  %v3629_v4 = vpop.f32.mrb[49].mxu1 }
 0x252   : > { %v3631_v41 = vpop.f32.mrb[50].mxu0 }
 0x253   : > { %v1274_v9 = vmax.f32 %v1272_v14, %v3631_v41  ;;  %v3634_v22 = vpop.f32.mrb[51].mxu0  ;;  %v3636_v32 = vpop.f32.mrb[50].mxu1 }
 0x254   : > { %4324 = vst [vmem:[#allocation110_spill] sm:$0xff] %v3634_v22  ;;  %v1343_v3 = vmax.f32 %v1341_v43, %v3634_v22  ;;  %v3639_v28 = vpop.f32.mrb[51].mxu1 }
 0x256   : > { %v3641_v11 = vpop.f32.mrb[52].mxu0 }
 0x257   : > { %v1275_v17 = vmax.f32 %v1273_v54, %v3641_v11  ;;  %v3644_v63 = vpop.f32.mrb[53].mxu0  ;;  %v3646_v1 = vpop.f32.mrb[52].mxu1 }
 0x258   : > { %4325 = vst [vmem:[#allocation111_spill] sm:$0xff] %v3644_v63  ;;  %v1344_v21 = vmax.f32 %v1342_v26, %v3644_v63  ;;  %v3649_v51 = vpop.f32.mrb[53].mxu1 }
 0x25a   : > { %v3651_v14 = vpop.f32.mrb[54].mxu0 }
 0x25b   : > { %v1276_v57 = vmax.f32 %v1274_v9, %v3651_v14  ;;  %v3654_v45 = vpop.f32.mrb[55].mxu0  ;;  %v3656_v43 = vpop.f32.mrb[54].mxu1 }
 0x25c   : > { %4326 = vst [vmem:[#allocation112_spill] sm:$0xff] %v3654_v45  ;;  %v1345_v22 = vmax.f32 %v1343_v3, %v3654_v45  ;;  %v3659_v20 = vpop.f32.mrb[55].mxu1 }
 0x25e   : > { %v3661_v54 = vpop.f32.mrb[56].mxu0 }
 0x25f   : > { %v1277_v36 = vmax.f32 %v1275_v17, %v3661_v54  ;;  %v3664_v38 = vpop.f32.mrb[57].mxu0  ;;  %v3666_v26 = vpop.f32.mrb[56].mxu1 }
 0x260   : > { %4327 = vst [vmem:[#allocation113_spill] sm:$0xff] %v3664_v38  ;;  %v1346_v63 = vmax.f32 %v1344_v21, %v3664_v38  ;;  %v3669_v60 = vpop.f32.mrb[57].mxu1 }
 0x262   : > { %v3671_v9 = vpop.f32.mrb[58].mxu0 }
 0x263   : > { %4328 = vst [vmem:[#allocation114_spill] sm:$0xff] %v3671_v9  ;;  %v1278_v30 = vmax.f32 %v1276_v57, %v3671_v9  ;;  %v3674_v55 = vpop.f32.mrb[59].mxu0  ;;  %v3676_v3 = vpop.f32.mrb[58].mxu1 }
 0x264   : > { %4329 = vst [vmem:[#allocation115_spill] sm:$0xff] %v3674_v55  ;;  %v1347_v45 = vmax.f32 %v1345_v22, %v3674_v55  ;;  %v3679_v44 = vpop.f32.mrb[59].mxu1 }
 0x266   : > { %v3681_v17 = vpop.f32.mrb[60].mxu0 }
 0x267   : > { %4330 = vst [vmem:[#allocation116_spill] sm:$0xff] %v3681_v17  ;;  %v1279_v34 = vmax.f32 %v1277_v36, %v3681_v17  ;;  %v3684_v58 = vpop.f32.mrb[61].mxu0  ;;  %v3686_v21 = vpop.f32.mrb[60].mxu1 }
 0x268   : > { %4331 = vst [vmem:[#allocation117_spill] sm:$0xff] %v3684_v58  ;;  %v1348_v38 = vmax.f32 %v1346_v63, %v3684_v58  ;;  %v3689_v0 = vpop.f32.mrb[61].mxu1 }
 0x269   : > { %v1300_v57 = vmax.f32 %v1298_v2, %v1279_v34 }
 0x26a   : > { %v1369_v33 = vmax.f32 %v1367_v6, %v1348_v38  ;;  %v3691_v52 = vpop.f32.mrb[62].mxu0 }
 0x26b   : > { %v1302_v22 = vmax.f32 %v1300_v57, %v3616_v37  ;;  %v1280_v55 = vmax.f32 %v1278_v30, %v3691_v52  ;;  %v3695_v25 = vpop.f32.mrb[63].mxu0  ;;  %v3697_v29 = vpop.f32.mrb[62].mxu1 }
 0x26c   : > { %v1371_v36 = vmax.f32 %v1369_v33, %v3619_v8  ;;  %v1349_v17 = vmax.f32 %v1347_v45, %v3695_v25  ;;  %v3701_v9 = vpop.f32.mrb[63].mxu1 }
 0x26d   : > { %v1304_v63 = vmax.f32 %v1302_v22, %v1280_v55 }
 0x26e   : > { %v1373_v58 = vmax.f32 %v1371_v36, %v1349_v17 }
 0x26f   : > { %v1306_v2 = vmax.f32 %v1304_v63, %v3626_v19 }
 0x270   : > { %v1375_v38 = vmax.f32 %v1373_v58, %v3629_v4 }
 0x271   : > { %v1307_v34 = vmax.f32 %v3636_v32, %v1306_v2 }
 0x272   : > { %v1376_v30 = vmax.f32 %v3639_v28, %v1375_v38 }
 0x273   : > { %v1308_v6 = vmax.f32 %v3646_v1, %v1307_v34 }
 0x274   : > { %v1377_v57 = vmax.f32 %v3649_v51, %v1376_v30 }
 0x275   : > { %v1309_v33 = vmax.f32 %v3656_v43, %v1308_v6 }
 0x276   : > { %v1378_v45 = vmax.f32 %v3659_v20, %v1377_v57 }
 0x277   : > { %v1310_v8 = vmax.f32 %v3666_v26, %v1309_v33 }
 0x278   : > { %v1379_v55 = vmax.f32 %v3669_v60, %v1378_v45 }
 0x279   : > { %v1311_v17 = vmax.f32 %v3676_v3, %v1310_v8 }
 0x27a   : > { %v1380_v58 = vmax.f32 %v3679_v44, %v1379_v55 }
 0x27b   : > { %v1312_v22 = vmax.f32 %v3686_v21, %v1311_v17 }
 0x27c   : > { %v1381_v36 = vmax.f32 %v3689_v0, %v1380_v58 }
 0x27d   : > { %v1313_v63 = vmax.f32 %v3697_v29, %v1312_v22 }
 0x27e   : > { %v3719_v2 = vmax.f32 %v3701_v9, %v1381_v36 }
 0x27f   : > { %v1314_v38 = vrot.slane %v1313_v63, 4 }
 0x281   : > { %v1315_v34 = vmax.f32 %v1313_v63, %v1314_v38 }
 0x283   : > { %v1316_v30 = vrot.slane %v1315_v34, 2 }
 0x285   : > { %v1317_v6 = vmax.f32 %v1315_v34, %v1316_v30 }
 0x287   : > { %v1318_v57 = vrot.slane %v1317_v6, 1 }
 0x289   : > { %v3721_v33 = vmax.f32 %v1317_v6, %v1318_v57 }
 0x28b   : > { %v1389_v8 = vsub.f32 %v3335_v13, %v3721_v33  ;;  %v1391_v45 = vsub.f32 %v3343_v5, %v3721_v33  ;;  %v1393_v17 = vsub.f32 %v3355_v42, %v3721_v33  ;;  %v1395_v22 = vsub.f32 %v3369_v48, %v3721_v33 }
 0x28c   : > { %v1397_v36 = vsub.f32 %v3383_v24, %v3721_v33  ;;  %v1399_v13 = vsub.f32 %v3395_v61, %v3721_v33  ;;  %v1401_v5 = vsub.f32 %v3407_v47, %v3721_v33  ;;  %v1403_v42 = vsub.f32 %v3419_v27, %v3721_v33 }
 0x28d   : > { %v1517_v55 = vmul.f32 1.442695, %v1389_v8  ;;  %v1521_v58 = vmul.f32 1.442695, %v1391_v45  ;;  %v1525_v63 = vmul.f32 1.442695, %v1393_v17  ;;  %v1405_v30 = vsub.f32 %v3431_v39, %v3721_v33 }
 0x28e   : > { %v1529_v38 = vmul.f32 1.442695, %v1395_v22  ;;  %v1533_v34 = vmul.f32 1.442695, %v1397_v36  ;;  %v1537_v48 = vmul.f32 1.442695, %v1399_v13  ;;  %v1407_v61 = vsub.f32 %v3443_v10, %v3721_v33 }
 0x28f   : > { %2362 = vpow2.f32 %v1517_v55  ;;  %v1541_v24 = vmul.f32 1.442695, %v1401_v5  ;;  %v1545_v8 = vmul.f32 1.442695, %v1403_v42  ;;  %v1409_v47 = vsub.f32 %v3455_v50, %v3721_v33 }
 0x290   : > { %2364 = vpow2.f32 %v1521_v58  ;;  %v1549_v45 = vmul.f32 1.442695, %v1405_v30  ;;  %v1411_v17 = vsub.f32 %v3467_v59, %v3721_v33  ;;  %v1553_v39 = vmul.f32 1.442695, %v1407_v61 }
 0x291   : > { %2366 = vpow2.f32 %v1525_v63  ;;  %v1413_v36 = vsub.f32 %v3479_v7, %v3721_v33  ;;  %v1557_v10 = vmul.f32 1.442695, %v1409_v47  ;;  %v1415_v50 = vsub.f32 %v3491_v49, %v3721_v33 }
 0x292   : > { %2368 = vpow2.f32 %v1529_v38  ;;  %v1561_v38 = vmul.f32 1.442695, %v1411_v17  ;;  %v1417_v59 = vsub.f32 %v3503_v31, %v3721_v33  ;;  %v1419_v7 = vsub.f32 %v3515_v40, %v3721_v33 }
 0x293   : > { %2370 = vpow2.f32 %v1533_v34  ;;  %v1565_v42 = vmul.f32 1.442695, %v1413_v36  ;;  %v1421_v49 = vsub.f32 %v3527_v53, %v3721_v33  ;;  %v1423_v31 = vsub.f32 %v3539_v16, %v3721_v33 }
 0x294   : > { %2372 = vpow2.f32 %v1537_v48  ;;  %v1573_v61 = vmul.f32 1.442695, %v1417_v59  ;;  %v1425_v17 = vsub.f32 %v3551_v23, %v3721_v33 }
 0x295   : > { %2374 = vpow2.f32 %v1541_v24  ;;  %v1569_v24 = vmul.f32 1.442695, %v1415_v50  ;;  %v1585_v36 = vmul.f32 1.442695, %v1423_v31 }
 0x296   : > { %2376 = vpow2.f32 %v1545_v8  ;;  %v1589_v50 = vmul.f32 1.442695, %v1425_v17 }
 0x297   : > { %2378 = vpow2.f32 %v1549_v45  ;;  %v1577_v45 = vmul.f32 1.442695, %v1419_v7 }
 0x298   : > { %2380 = vpow2.f32 %v1553_v39  ;;  %v1581_v39 = vmul.f32 1.442695, %v1421_v49  ;;  %v1437_v49 = vsub.f32 %v3621_v62, %v3721_v33 }
 0x299   : > { %v2363_v6 = vpop.eup %2362  ;;  %2382 = vpow2.f32 %v1557_v10 }
 0x29a   : > { %v2365_v57 = vpop.eup %2364  ;;  %2384 = vpow2.f32 %v1561_v38 }
 0x29b   : > { %v1773_v27 = vadd.f32 %v2365_v57, %v2363_v6  ;;  %v2367_v55 = vpop.eup %2366  ;;  %2386 = vpow2.f32 %v1565_v42 }
 0x29c   : > { %v2369_v22 = vpop.eup %2368  ;;  %2388 = vpow2.f32 %v1569_v24 }
 0x29d   : > { %v1774_v58 = vadd.f32 %v2367_v55, %v1773_v27  ;;  %v2371_v13 = vpop.eup %2370  ;;  %v1383_v27 = vrot.slane %v3719_v2, 4  ;;  %2390 = vpow2.f32 %v1573_v61 }
 0x29e   : > { %v2373_v34 = vpop.eup %2372  ;;  %2392 = vpow2.f32 %v1577_v45 }
 0x29f   : > { %v1775_v63 = vadd.f32 %v2369_v22, %v1774_v58  ;;  %v2375_v30 = vpop.eup %2374  ;;  %v1427_v22 = vsub.f32 %v3563_v18, %v3721_v33  ;;  %v1384_v16 = vmax.f32 %v3719_v2, %v1383_v27  ;;  %2394 = vpow2.f32 %v1581_v39 }
 0x2a0   : > { %v2377_v57 = vpop.eup %2376  ;;  %2396 = vpow2.f32 %v1585_v36  ;;  %v1433_v2 = vsub.f32 %v3599_v35, %v3721_v33  ;;  %v1439_v35 = vsub.f32 %v3631_v41, %v3721_v33  ;;  %v1443_v39 = vsub.f32 %v3651_v14, %v3721_v33  ;;  %v2626_v41 = vld [vmem:[%s3015_s20 + $0x28] sm:$0xff] }
 0x2a1   : > { %v1776_v5 = vadd.f32 %v2371_v13, %v1775_v63  ;;  %v2379_v47 = vpop.eup %2378  ;;  %v1429_v13 = vsub.f32 %v3575_v15, %v3721_v33  ;;  %v1385_v59 = vrot.slane %v1384_v16, 2  ;;  %2398 = vpow2.f32 %v1589_v50  ;;  %v4332_v14 = vld [vmem:[#allocation114_spill] sm:$0xff] }
 0x2a2   : > { %v2381_v40 = vpop.eup %2380  ;;  %v1435_v15 = vsub.f32 %v3611_v12, %v3721_v33  ;;  %v1605_v61 = vmul.f32 1.442695, %v1433_v2  ;;  %v1447_v50 = vsub.f32 %v4332_v14, %v3721_v33  ;;  %v4335_v2 = vld [vmem:[#allocation35_spill] sm:$0xff]  ;;  %v4344_v14 = vld [vmem:[#allocation50_spill] sm:$0xff] }
 0x2a3   : > { %v1777_v48 = vadd.f32 %v2373_v34, %v1776_v5  ;;  %v2383_v53 = vpop.eup %2382  ;;  %v1431_v5 = vsub.f32 %v3587_v56, %v3721_v33  ;;  %v1593_v34 = vmul.f32 1.442695, %v1427_v22  ;;  %v426_v22 = vmul.f32 %v2626_v41, %v3158_v46  ;;  %v4342_v41 = vld [vmem:[#allocation47_spill] sm:$0xff] }
 0x2a4   : > { %v2385_v63 = vpop.eup %2384  ;;  %v1609_v31 = vmul.f32 1.442695, %v1435_v15 }
 0x2a5   : > { %v1778_v6 = vadd.f32 %v2375_v30, %v1777_v48  ;;  %v2387_v23 = vpop.eup %2386  ;;  %v1597_v48 = vmul.f32 1.442695, %v1429_v13  ;;  %2400 = vpow2.f32 %v1593_v34  ;;  %v1601_v24 = vmul.f32 1.442695, %v1431_v5  ;;  %v4333_v34 = vld [vmem:[#allocation38_spill] sm:$0xff] }
 0x2a6   : > { %v2389_v42 = vpop.eup %2388  ;;  %v1625_v5 = vmul.f32 1.442695, %v1443_v39 }
 0x2a7   : > { %v1779_v8 = vadd.f32 %v2377_v57, %v1778_v6  ;;  %v2391_v7 = vpop.eup %2390  ;;  %v1386_v6 = vmax.f32 %v1384_v16, %v1385_v59  ;;  %2402 = vpow2.f32 %v1597_v48 }
 0x2a8   : > { %v2393_v56 = vpop.eup %2392  ;;  %2404 = vpow2.f32 %v1601_v24  ;;  %v4337_v24 = vld [vmem:[#allocation36_spill] sm:$0xff] }
 0x2a9   : > { %v1780_v55 = vadd.f32 %v2379_v47, %v1779_v8  ;;  %v2395_v47 = vpop.eup %2394  ;;  %v1387_v45 = vrot.slane %v1386_v6, 1  ;;  %2406 = vpow2.f32 %v1605_v61  ;;  %v4339_v61 = vld [vmem:[#allocation30_spill] sm:$0xff] }
 0x2aa   : > { %v2397_v27 = vpop.eup %2396  ;;  %2408 = vpow2.f32 %v1609_v31  ;;  %v4340_v31 = vld [vmem:[#allocation44_spill] sm:$0xff] }
 0x2ab   : > { %v1781_v58 = vadd.f32 %v2381_v40, %v1780_v55  ;;  %v1441_v55 = vsub.f32 %v3641_v11, %v3721_v33  ;;  %v1613_v40 = vmul.f32 1.442695, %v1437_v49  ;;  %v2399_v17 = vpop.eup %2398  ;;  %v1445_v11 = vsub.f32 %v3661_v54, %v3721_v33  ;;  %v2628_v54 = vld [vmem:[%s3015_s20 + $0x20] sm:$0xff] }
 0x2ac   : > { %v425_v48 = vmul.f32 %v2628_v54, %v4335_v2 }
 0x2ad   : > { %v1782_v10 = vadd.f32 %v2383_v53, %v1781_v58  ;;  %v1617_v58 = vmul.f32 1.442695, %v1439_v35  ;;  %v3781_v53 = vmax.f32 %v1386_v6, %v1387_v45  ;;  %2410 = vpow2.f32 %v1613_v40 }
 0x2ae   : > { %v1210_v6 = vrot.slane %v4337_v24, 4  ;;  %v1629_v49 = vmul.f32 1.442695, %v1445_v11  ;;  %v1451_v40 = vsub.f32 %v3691_v52, %v3721_v33 }
 0x2af   : > { %v1783_v38 = vadd.f32 %v2385_v63, %v1782_v10  ;;  %v2401_v16 = vpop.eup %2400  ;;  %v1621_v10 = vmul.f32 1.442695, %v1441_v55  ;;  %v2627_v63 = vld [vmem:[%s3015_s20 + $0x38] sm:$0xff]  ;;  %2412 = vpow2.f32 %v1617_v58  ;;  %v1390_v59 = vsub.f32 %v4333_v34, %v3781_v53 }
 0x2b0   : > { %v428_v13 = vmul.f32 %v2627_v63, %v3158_v46  ;;  %v4336_v46 = vld [vmem:[#allocation41_spill] sm:$0xff]  ;;  %v1394_v45 = vsub.f32 %v4340_v31, %v3781_v53  ;;  %v3818_v11 = vadd.f32 %v1210_v6, %v4337_v24  ;;  %v1641_v54 = vmul.f32 1.442695, %v1451_v40  ;;  %v4350_v31 = vld [vmem:[#allocation48_spill] sm:$0xff] }
 0x2b1   : > { %v1784_v18 = vadd.f32 %v2387_v23, %v1783_v38  ;;  %v2403_v23 = vpop.eup %2402  ;;  %2414 = vpow2.f32 %v1621_v10  ;;  %v4343_v10 = vld [vmem:[#allocation39_spill] sm:$0xff]  ;;  %v4348_v24 = vld [vmem:[#allocation45_spill] sm:$0xff] }
 0x2b2   : > { %v2405_v15 = vpop.eup %2404  ;;  %2416 = vpow2.f32 %v1625_v5  ;;  %v1453_v63 = vsub.f32 %v4343_v10, %v3721_v33  ;;  %v4345_v5 = vld [vmem:[#allocation34_spill] sm:$0xff]  ;;  %v1457_v6 = vsub.f32 %v4348_v24, %v3721_v33 }
 0x2b3   : > { %v1785_v30 = vadd.f32 %v2389_v42, %v1784_v18  ;;  %v4334_v18 = vld [vmem:[#allocation29_spill] sm:$0xff]  ;;  %2418 = vpow2.f32 %v1629_v49  ;;  %v4349_v49 = vld [vmem:[#allocation56_spill] sm:$0xff] }
 0x2b4   : > { %v3794_v42 = vmul.f32 %v426_v22, %v4334_v18  ;;  %v1396_v22 = vsub.f32 %v4342_v41, %v3781_v53 }
 0x2b5   : > { %v1786_v57 = vadd.f32 %v2391_v7, %v1785_v30  ;;  %v1392_v7 = vsub.f32 %v4336_v46, %v3781_v53 }
 0x2b6   : > { %v1531_v46 = vmul.f32 1.442695, %v1396_v22  ;;  %v4353_v22 = vld [vmem:[#allocation54_spill] sm:$0xff] }
 0x2b7   : > { %v1787_v8 = vadd.f32 %v2393_v56, %v1786_v57  ;;  %v4338_v57 = vld [vmem:[#allocation116_spill] sm:$0xff] }
 0x2b8   : > { %v1449_v56 = vsub.f32 %v4338_v57, %v3721_v33  ;;  %v1645_v57 = vmul.f32 1.442695, %v1453_v63  ;;  %v1653_v63 = vmul.f32 1.442695, %v1457_v6  ;;  %v4359_v6 = vld [vmem:[#allocation66_spill] sm:$0xff] }
 0x2b9   : > { %v1788_v12 = vadd.f32 %v2395_v47, %v1787_v8  ;;  %v3804_v8 = vmul.f32 %v428_v13, %v4339_v61  ;;  %v1633_v47 = vmul.f32 1.442695, %v1447_v50  ;;  %v1398_v50 = vsub.f32 %v4344_v14, %v3781_v53 }
 0x2ba   : > { %v1637_v13 = vmul.f32 1.442695, %v1449_v56  ;;  %v1402_v61 = vsub.f32 %v4349_v49, %v3781_v53 }
 0x2bb   : > { %v1789_v62 = vadd.f32 %v2397_v27, %v1788_v12  ;;  %v2407_v12 = vpop.eup %2406  ;;  %v2629_v27 = vld [vmem:[%s3015_s20 + $0x30] sm:$0xff]  ;;  %2420 = vpow2.f32 %v1633_v47  ;;  %v1535_v47 = vmul.f32 1.442695, %v1398_v50 }
 0x2bc   : > { %v427_v55 = vmul.f32 %v2629_v27, %v4335_v2  ;;  %v1543_v50 = vmul.f32 1.442695, %v1402_v61 }
 0x2bd   : > { %v1790_v36 = vadd.f32 %v2399_v17, %v1789_v62  ;;  %v1519_v62 = vmul.f32 1.442695, %v1390_v59  ;;  %v4341_v17 = vld [vmem:[#allocation33_spill] sm:$0xff]  ;;  %v4346_v59 = vld [vmem:[#allocation42_spill] sm:$0xff] }
 0x2be   : > { %v3813_v39 = vmul.f32 %v425_v48, %v4341_v17  ;;  %v3825_v34 = vmul.f32 %v427_v55, %v4345_v5  ;;  %v1455_v18 = vsub.f32 %v4346_v59, %v3721_v33  ;;  %v4347_v48 = vld [vmem:[#allocation53_spill] sm:$0xff]  ;;  %v4357_v59 = vld [vmem:[#allocation63_spill] sm:$0xff] }
 0x2bf   : > { %v1791_v38 = vadd.f32 %v2401_v16, %v1790_v36  ;;  %v1523_v36 = vmul.f32 1.442695, %v1392_v7  ;;  %v2409_v16 = vpop.eup %2408  ;;  %2422 = vpow2.f32 %v1519_v62  ;;  %v4352_v62 = vld [vmem:[#allocation59_spill] sm:$0xff] }
 0x2c0   : > { %v1649_v55 = vmul.f32 1.442695, %v1455_v18  ;;  %v1404_v17 = vsub.f32 %v4352_v62, %v3781_v53  ;;  %v1469_v18 = vsub.f32 %v4357_v59, %v3721_v33 }
 0x2c1   : > { %v1792_v30 = vadd.f32 %v2403_v23, %v1791_v38  ;;  %v1527_v38 = vmul.f32 1.442695, %v1394_v45  ;;  %v2411_v23 = vpop.eup %2410  ;;  %2424 = vpow2.f32 %v1523_v36  ;;  %v1459_v45 = vsub.f32 %v4350_v31, %v3721_v33 }
 0x2c2   : > { %v2413_v7 = vpop.eup %2412  ;;  %2426 = vpow2.f32 %v1637_v13  ;;  %v1463_v36 = vsub.f32 %v4353_v22, %v3721_v33 }
 0x2c3   : > { %v1793_v35 = vadd.f32 %v2405_v15, %v1792_v30  ;;  %v1400_v30 = vsub.f32 %v4347_v48, %v3781_v53  ;;  %v1212_v15 = vrot.slane %v3818_v11, 2  ;;  %2428 = vpow2.f32 %v1527_v38 }
 0x2c4   : > { %2430 = vpow2.f32 %v1641_v54  ;;  %v1657_v54 = vmul.f32 1.442695, %v1459_v45  ;;  %v1665_v49 = vmul.f32 1.442695, %v1463_v36 }
 0x2c5   : > { %v1794_v58 = vadd.f32 %v2407_v12, %v1793_v35  ;;  %v2415_v35 = vpop.eup %2414  ;;  %v4351_v12 = vld [vmem:[#allocation51_spill] sm:$0xff]  ;;  %2432 = vpow2.f32 %v1531_v46 }
 0x2c6   : > { %v1461_v27 = vsub.f32 %v4351_v12, %v3721_v33  ;;  %v2417_v41 = vpop.eup %2416  ;;  %2434 = vpow2.f32 %v1645_v57  ;;  %v1471_v57 = vsub.f32 %v4359_v6, %v3721_v33  ;;  %v4366_v6 = vld [vmem:[#allocation69_spill] sm:$0xff] }
 0x2c7   : > { %v1795_v52 = vadd.f32 %v2409_v16, %v1794_v58  ;;  %v1539_v58 = vmul.f32 1.442695, %v1400_v30  ;;  %v4354_v16 = vld [vmem:[#allocation57_spill] sm:$0xff]  ;;  %2436 = vpow2.f32 %v1535_v47  ;;  %v2419_v38 = vpop.eup %2418 }
 0x2c8   : > { %v1465_v10 = vsub.f32 %v4354_v16, %v3721_v33  ;;  %2438 = vpow2.f32 %v1649_v55  ;;  %v4358_v30 = vld [vmem:[#allocation65_spill] sm:$0xff] }
 0x2c9   : > { %v1796_v2 = vadd.f32 %v2411_v23, %v1795_v52  ;;  %v4355_v52 = vld [vmem:[#allocation62_spill] sm:$0xff]  ;;  %v4356_v23 = vld [vmem:[#allocation60_spill] sm:$0xff]  ;;  %v1408_v46 = vsub.f32 %v4358_v30, %v3781_v53  ;;  %2440 = vpow2.f32 %v1539_v58 }
 0x2ca   : > { %v1406_v14 = vsub.f32 %v4355_v52, %v3781_v53  ;;  %v1467_v5 = vsub.f32 %v4356_v23, %v3721_v33  ;;  %2442 = vpow2.f32 %v1653_v63  ;;  %v1669_v55 = vmul.f32 1.442695, %v1465_v10  ;;  %v4362_v63 = vld [vmem:[#allocation37_spill] sm:$0xff]  ;;  %v4363_v52 = vld [vmem:[#allocation31_spill] sm:$0xff] }
 0x2cb   : > { %v1797_v56 = vadd.f32 %v2413_v7, %v1796_v2  ;;  %v2421_v2 = vpop.eup %2420  ;;  %v1547_v7 = vmul.f32 1.442695, %v1404_v17  ;;  %2444 = vpow2.f32 %v1543_v50 }
 0x2cc   : > { %v2423_v24 = vpop.eup %2422  ;;  %v1551_v45 = vmul.f32 1.442695, %v1406_v14  ;;  %2446 = vpow2.f32 %v1657_v54  ;;  %v1243_v14 = vadd.f32 %v4363_v52, %v3794_v42  ;;  %v4365_v42 = vld [vmem:[#allocation77_spill] sm:$0xff] }
 0x2cd   : > { %v1798_v40 = vadd.f32 %v2415_v35, %v1797_v56  ;;  %v1661_v56 = vmul.f32 1.442695, %v1461_v27  ;;  %v2425_v61 = vpop.eup %2424  ;;  %v4360_v35 = vld [vmem:[#allocation68_spill] sm:$0xff]  ;;  %2448 = vpow2.f32 %v1547_v7  ;;  %v1555_v27 = vmul.f32 1.442695, %v1408_v46 }
 0x2ce   : > { %v1410_v31 = vsub.f32 %v4360_v35, %v3781_v53  ;;  %v2427_v12 = vpop.eup %2426  ;;  %v1842_v62 = vadd.f32 %v2425_v61, %v2423_v24  ;;  %v1416_v46 = vsub.f32 %v4365_v42, %v3781_v53  ;;  %v4367_v35 = vld [vmem:[#allocation80_spill] sm:$0xff]  ;;  %v4373_v42 = vld [vmem:[#allocation89_spill] sm:$0xff] }
 0x2cf   : > { %v1799_v13 = vadd.f32 %v2417_v41, %v1798_v40  ;;  %v1673_v40 = vmul.f32 1.442695, %v1467_v5  ;;  %v2429_v17 = vpop.eup %2428  ;;  %v4361_v41 = vld [vmem:[#allocation71_spill] sm:$0xff]  ;;  %2450 = vpow2.f32 %v1661_v56  ;;  %v1473_v56 = vsub.f32 %v4366_v6, %v3721_v33  ;;  %v4374_v6 = vld [vmem:[#allocation81_spill] sm:$0xff] }
 0x2d0   : > { %v1412_v22 = vsub.f32 %v4361_v41, %v3781_v53  ;;  %v2431_v36 = vpop.eup %2430  ;;  %v1843_v16 = vadd.f32 %v2429_v17, %v1842_v62  ;;  %2452 = vpow2.f32 %v1551_v45  ;;  %v1559_v5 = vmul.f32 1.442695, %v1410_v31 }
 0x2d1   : > { %v1800_v48 = vadd.f32 %v2419_v38, %v1799_v13  ;;  %v1234_v13 = vadd.f32 %v4362_v63, %v3813_v39  ;;  %v2433_v50 = vpop.eup %2432  ;;  %v4364_v38 = vld [vmem:[#allocation74_spill] sm:$0xff]  ;;  %2454 = vpow2.f32 %v1665_v49  ;;  %v1677_v49 = vmul.f32 1.442695, %v1469_v18 }
 0x2d2   : > { %v1414_v23 = vsub.f32 %v4364_v38, %v3781_v53  ;;  %v2435_v59 = vpop.eup %2434  ;;  %v1844_v54 = vadd.f32 %v2433_v50, %v1843_v16  ;;  %2456 = vpow2.f32 %v1555_v27  ;;  %v1563_v7 = vmul.f32 1.442695, %v1412_v22  ;;  %v4370_v16 = vld [vmem:[#allocation75_spill] sm:$0xff] }
 0x2d3   : > { %v1801_v47 = vadd.f32 %v2421_v2, %v1800_v48  ;;  %v3867_v2 = vadd.f32 %v1234_v13, %v3825_v34  ;;  %v3870_v48 = vadd.f32 %v1243_v14, %v3804_v8  ;;  %v2437_v39 = vpop.eup %2436  ;;  %2458 = vpow2.f32 %v1669_v55  ;;  %v4369_v55 = vld [vmem:[#allocation83_spill] sm:$0xff] }
 0x2d4   : > { %v2439_v24 = vpop.eup %2438  ;;  %v1845_v61 = vadd.f32 %v2437_v39, %v1844_v54  ;;  %v1418_v8 = vsub.f32 %v4367_v35, %v3781_v53  ;;  %2460 = vpow2.f32 %v1559_v5  ;;  %v1567_v31 = vmul.f32 1.442695, %v1414_v23  ;;  %v4372_v23 = vld [vmem:[#allocation78_spill] sm:$0xff]  ;;  %v4375_v35 = vld [vmem:[#allocation92_spill] sm:$0xff] }
 0x2d5   : > { %v1802_v58 = vadd.f32 %v2427_v12, %v1801_v47  ;;  %v2441_v47 = vpop.eup %2440  ;;  %v4368_v12 = vld [vmem:[#allocation72_spill] sm:$0xff]  ;;  %2462 = vpow2.f32 %v1673_v40  ;;  %v1681_v17 = vmul.f32 1.442695, %v1471_v57  ;;  %v1420_v18 = vsub.f32 %v4369_v55, %v3781_v53  ;;  %v4371_v40 = vld [vmem:[#allocation86_spill] sm:$0xff]  ;;  %v4377_v55 = vld [vmem:[#allocation95_spill] sm:$0xff] }
 0x2d6   : > { %v2443_v45 = vpop.eup %2442  ;;  %v1475_v62 = vsub.f32 %v4368_v12, %v3721_v33  ;;  %2464 = vpow2.f32 %v1563_v7  ;;  %v1571_v27 = vmul.f32 1.442695, %v1416_v46  ;;  %v1477_v63 = vsub.f32 %v4370_v16, %v3721_v33  ;;  %v4376_v12 = vld [vmem:[#allocation84_spill] sm:$0xff]  ;;  %v4378_v16 = vld [vmem:[#allocation87_spill] sm:$0xff] }
 0x2d7   : > { %v1803_v10 = vadd.f32 %v2431_v36, %v1802_v58  ;;  %v1846_v58 = vadd.f32 %v2441_v47, %v1845_v61  ;;  %v2445_v41 = vpop.eup %2444  ;;  %2466 = vpow2.f32 %v1677_v49  ;;  %v1685_v13 = vmul.f32 1.442695, %v1473_v56 }
 0x2d8   : > { %v2447_v36 = vpop.eup %2446  ;;  %v1422_v57 = vsub.f32 %v4371_v40, %v3781_v53  ;;  %2468 = vpow2.f32 %v1567_v31  ;;  %v1479_v5 = vsub.f32 %v4372_v23, %v3721_v33  ;;  %v1424_v46 = vsub.f32 %v4373_v42, %v3781_v53  ;;  %v4379_v40 = vld [vmem:[#allocation98_spill] sm:$0xff]  ;;  %v4381_v42 = vld [vmem:[#allocation101_spill] sm:$0xff] }
 0x2d9   : > { %v1804_v30 = vadd.f32 %v2435_v59, %v1803_v10  ;;  %v1847_v52 = vadd.f32 %v2445_v41, %v1846_v58  ;;  %v2449_v14 = vpop.eup %2448  ;;  %v1575_v10 = vmul.f32 1.442695, %v1418_v8  ;;  %2470 = vpow2.f32 %v1681_v17  ;;  %v4380_v23 = vld [vmem:[#allocation90_spill] sm:$0xff] }
 0x2da   : > { %v2451_v38 = vpop.eup %2450  ;;  %v1689_v59 = vmul.f32 1.442695, %v1475_v62  ;;  %2472 = vpow2.f32 %v1571_v27  ;;  %v1579_v7 = vmul.f32 1.442695, %v1420_v18  ;;  %v1481_v56 = vsub.f32 %v4374_v6, %v3721_v33  ;;  %v4382_v6 = vld [vmem:[#allocation93_spill] sm:$0xff] }
 0x2db   : > { %v1805_v34 = vadd.f32 %v2439_v24, %v1804_v30  ;;  %v1848_v54 = vadd.f32 %v2449_v14, %v1847_v52  ;;  %v2453_v39 = vpop.eup %2452  ;;  %2474 = vpow2.f32 %v1685_v13  ;;  %v1693_v49 = vmul.f32 1.442695, %v1477_v63 }
 0x2dc   : > { %v2455_v24 = vpop.eup %2454  ;;  %v1426_v8 = vsub.f32 %v4375_v35, %v3781_v53  ;;  %2476 = vpow2.f32 %v1575_v10  ;;  %v1583_v31 = vmul.f32 1.442695, %v1422_v57  ;;  %v1483_v62 = vsub.f32 %v4376_v12, %v3721_v33  ;;  %v4383_v35 = vld [vmem:[#allocation104_spill] sm:$0xff] }
 0x2dd   : > { %v1806_v22 = vadd.f32 %v2443_v45, %v1805_v34  ;;  %v1849_v61 = vadd.f32 %v2453_v39, %v1848_v54  ;;  %v2457_v47 = vpop.eup %2456  ;;  %2478 = vpow2.f32 %v1689_v59  ;;  %v1697_v17 = vmul.f32 1.442695, %v1479_v5  ;;  %v4384_v12 = vld [vmem:[#allocation96_spill] sm:$0xff] }
 0x2de   : > { %v2459_v45 = vpop.eup %2458  ;;  %v1428_v18 = vsub.f32 %v4377_v55, %v3781_v53  ;;  %2480 = vpow2.f32 %v1579_v7  ;;  %v1587_v27 = vmul.f32 1.442695, %v1424_v46  ;;  %v1485_v63 = vsub.f32 %v4378_v16, %v3721_v33  ;;  %v4385_v55 = vld [vmem:[#allocation107_spill] sm:$0xff] }
 0x2df   : > { %v1807_v50 = vadd.f32 %v2447_v36, %v1806_v22  ;;  %v1850_v58 = vadd.f32 %v2457_v47, %v1849_v61  ;;  %v2461_v41 = vpop.eup %2460  ;;  %2482 = vpow2.f32 %v1693_v49  ;;  %v1701_v13 = vmul.f32 1.442695, %v1481_v56  ;;  %v4386_v16 = vld [vmem:[#allocation99_spill] sm:$0xff] }
 0x2e0   : > { %v2463_v36 = vpop.eup %2462  ;;  %v1430_v57 = vsub.f32 %v4379_v40, %v3781_v53  ;;  %2484 = vpow2.f32 %v1583_v31  ;;  %v1591_v10 = vmul.f32 1.442695, %v1426_v8  ;;  %v1487_v5 = vsub.f32 %v4380_v23, %v3721_v33  ;;  %v4387_v40 = vld [vmem:[#allocation109_spill] sm:$0xff]  ;;  %v4388_v23 = vld [vmem:[#allocation102_spill] sm:$0xff] }
 0x2e1   : > { %v1808_v30 = vadd.f32 %v2451_v38, %v1807_v50  ;;  %v1851_v52 = vadd.f32 %v2461_v41, %v1850_v58  ;;  %v2465_v14 = vpop.eup %2464  ;;  %2486 = vpow2.f32 %v1697_v17  ;;  %v1705_v59 = vmul.f32 1.442695, %v1483_v62 }
 0x2e2   : > { %v2467_v38 = vpop.eup %2466  ;;  %v1432_v46 = vsub.f32 %v4381_v42, %v3781_v53  ;;  %2488 = vpow2.f32 %v1587_v27  ;;  %v1595_v7 = vmul.f32 1.442695, %v1428_v18  ;;  %v1489_v56 = vsub.f32 %v4382_v6, %v3721_v33  ;;  %v4389_v42 = vld [vmem:[#allocation110_spill] sm:$0xff]  ;;  %v4390_v6 = vld [vmem:[#allocation105_spill] sm:$0xff] }
 0x2e3   : > { %v1809_v34 = vadd.f32 %v2455_v24, %v1808_v30  ;;  %v1852_v54 = vadd.f32 %v2465_v14, %v1851_v52  ;;  %v2469_v39 = vpop.eup %2468  ;;  %2490 = vpow2.f32 %v1701_v13  ;;  %v1709_v49 = vmul.f32 1.442695, %v1485_v63 }
 0x2e4   : > { %v2471_v24 = vpop.eup %2470  ;;  %v1434_v8 = vsub.f32 %v4383_v35, %v3781_v53  ;;  %2492 = vpow2.f32 %v1591_v10  ;;  %v1599_v31 = vmul.f32 1.442695, %v1430_v57  ;;  %v1491_v62 = vsub.f32 %v4384_v12, %v3721_v33  ;;  %v4391_v35 = vld [vmem:[#allocation111_spill] sm:$0xff] }
 0x2e5   : > { %v1810_v22 = vadd.f32 %v2459_v45, %v1809_v34  ;;  %v1853_v61 = vadd.f32 %v2469_v39, %v1852_v54  ;;  %v2473_v47 = vpop.eup %2472  ;;  %2494 = vpow2.f32 %v1705_v59  ;;  %v1713_v17 = vmul.f32 1.442695, %v1487_v5 }
 0x2e6   : > { %v2475_v45 = vpop.eup %2474  ;;  %v1436_v18 = vsub.f32 %v4385_v55, %v3781_v53  ;;  %2496 = vpow2.f32 %v1595_v7  ;;  %v1603_v27 = vmul.f32 1.442695, %v1432_v46  ;;  %v1493_v63 = vsub.f32 %v4386_v16, %v3721_v33 }
 0x2e7   : > { %v1811_v50 = vadd.f32 %v2463_v36, %v1810_v22  ;;  %v1854_v58 = vadd.f32 %v2473_v47, %v1853_v61  ;;  %v2477_v41 = vpop.eup %2476  ;;  %2498 = vpow2.f32 %v1709_v49  ;;  %v1717_v13 = vmul.f32 1.442695, %v1489_v56 }
 0x2e8   : > { %v2479_v36 = vpop.eup %2478  ;;  %v1438_v57 = vsub.f32 %v4387_v40, %v3781_v53  ;;  %2500 = vpow2.f32 %v1599_v31  ;;  %v1607_v10 = vmul.f32 1.442695, %v1434_v8  ;;  %v1495_v5 = vsub.f32 %v4388_v23, %v3721_v33 }
 0x2e9   : > { %v1812_v30 = vadd.f32 %v2467_v38, %v1811_v50  ;;  %v1855_v52 = vadd.f32 %v2477_v41, %v1854_v58  ;;  %v2481_v14 = vpop.eup %2480  ;;  %2502 = vpow2.f32 %v1713_v17  ;;  %v1721_v59 = vmul.f32 1.442695, %v1491_v62 }
 0x2ea   : > { %v2483_v38 = vpop.eup %2482  ;;  %v1440_v46 = vsub.f32 %v4389_v42, %v3781_v53  ;;  %2504 = vpow2.f32 %v1603_v27  ;;  %v1611_v7 = vmul.f32 1.442695, %v1436_v18  ;;  %v1497_v56 = vsub.f32 %v4390_v6, %v3721_v33 }
 0x2eb   : > { %v1813_v34 = vadd.f32 %v2471_v24, %v1812_v30  ;;  %v1856_v54 = vadd.f32 %v2481_v14, %v1855_v52  ;;  %v2485_v39 = vpop.eup %2484  ;;  %2506 = vpow2.f32 %v1717_v13  ;;  %v1725_v49 = vmul.f32 1.442695, %v1493_v63 }
 0x2ec   : > { %v2487_v24 = vpop.eup %2486  ;;  %v1442_v8 = vsub.f32 %v4391_v35, %v3781_v53  ;;  %2508 = vpow2.f32 %v1607_v10  ;;  %v1615_v31 = vmul.f32 1.442695, %v1438_v57  ;;  %v1499_v12 = vsub.f32 %v3616_v37, %v3721_v33  ;;  %v4393_v37 = vld [vmem:[#allocation113_spill] sm:$0xff] }
 0x2ed   : > { %v1814_v22 = vadd.f32 %v2475_v45, %v1813_v34  ;;  %v1857_v61 = vadd.f32 %v2485_v39, %v1856_v54  ;;  %v2489_v47 = vpop.eup %2488  ;;  %2510 = vpow2.f32 %v1721_v59  ;;  %v1729_v62 = vmul.f32 1.442695, %v1495_v5 }
 0x2ee   : > { %v2491_v45 = vpop.eup %2490  ;;  %2512 = vpow2.f32 %v1611_v7  ;;  %v1619_v18 = vmul.f32 1.442695, %v1440_v46  ;;  %v1733_v16 = vmul.f32 1.442695, %v1497_v56  ;;  %v1446_v14 = vsub.f32 %v4393_v37, %v3781_v53 }
 0x2ef   : > { %v1815_v50 = vadd.f32 %v2479_v36, %v1814_v22  ;;  %v1858_v17 = vadd.f32 %v2489_v47, %v1857_v61  ;;  %v2493_v58 = vpop.eup %2492  ;;  %v4392_v22 = vld [vmem:[#allocation112_spill] sm:$0xff]  ;;  %v1501_v36 = vsub.f32 %v3626_v19, %v3721_v33  ;;  %2514 = vpow2.f32 %v1725_v49  ;;  %v4394_v19 = vld [vmem:[#allocation115_spill] sm:$0xff] }
 0x2f0   : > { %v1444_v55 = vsub.f32 %v4392_v22, %v3781_v53  ;;  %v2495_v27 = vpop.eup %2494  ;;  %2516 = vpow2.f32 %v1615_v31  ;;  %v1503_v57 = vsub.f32 %v3636_v32, %v3721_v33  ;;  %v1737_v10 = vmul.f32 1.442695, %v1499_v12  ;;  %v4395_v32 = vld [vmem:[#allocation117_spill] sm:$0xff] }
 0x2f1   : > { %v1816_v30 = vadd.f32 %v2483_v38, %v1815_v50  ;;  %v1859_v63 = vadd.f32 %v2493_v58, %v1858_v17  ;;  %v2497_v13 = vpop.eup %2496  ;;  %v1623_v50 = vmul.f32 1.442695, %v1442_v8  ;;  %2518 = vpow2.f32 %v1729_v62 }
 0x2f2   : > { %v2499_v40 = vpop.eup %2498  ;;  %v1448_v59 = vsub.f32 %v4394_v19, %v3781_v53  ;;  %2520 = vpow2.f32 %v1619_v18  ;;  %v1627_v54 = vmul.f32 1.442695, %v1444_v55  ;;  %v1741_v42 = vmul.f32 1.442695, %v1501_v36 }
 0x2f3   : > { %v1817_v34 = vadd.f32 %v2487_v24, %v1816_v30  ;;  %v1860_v38 = vadd.f32 %v2497_v13, %v1859_v63  ;;  %v2501_v23 = vpop.eup %2500  ;;  %v1505_v30 = vsub.f32 %v3646_v1, %v3721_v33  ;;  %2522 = vpow2.f32 %v1733_v16 }
 0x2f4   : > { %v2503_v39 = vpop.eup %2502  ;;  %v1450_v6 = vsub.f32 %v4395_v32, %v3781_v53  ;;  %2524 = vpow2.f32 %v1623_v50  ;;  %v1631_v56 = vmul.f32 1.442695, %v1446_v14  ;;  %v1507_v61 = vsub.f32 %v3656_v43, %v3721_v33  ;;  %v4396_v43 = vld [vmem:[#allocation40_spill] sm:$0xff] }
 0x2f5   : > { %v1818_v41 = vadd.f32 %v2491_v45, %v1817_v34  ;;  %v1861_v46 = vadd.f32 %v2501_v23, %v1860_v38  ;;  %v2505_v7 = vpop.eup %2504  ;;  %2526 = vpow2.f32 %v1737_v10  ;;  %v1745_v47 = vmul.f32 1.442695, %v1503_v57 }
 0x2f6   : > { %v2507_v49 = vpop.eup %2506  ;;  %v1452_v1 = vsub.f32 %v3695_v25, %v3781_v53  ;;  %2528 = vpow2.f32 %v1627_v54  ;;  %v1635_v31 = vmul.f32 1.442695, %v1448_v59  ;;  %v1509_v12 = vsub.f32 %v3666_v26, %v3721_v33  ;;  %v4397_v26 = vld [vmem:[#allocation43_spill] sm:$0xff] }
 0x2f7   : > { %v1819_v52 = vadd.f32 %v2495_v27, %v1818_v41  ;;  %v1862_v34 = vadd.f32 %v2505_v7, %v1861_v46  ;;  %v2509_v35 = vpop.eup %2508  ;;  %2530 = vpow2.f32 %v1741_v42  ;;  %v1749_v62 = vmul.f32 1.442695, %v1505_v30 }
 0x2f8   : > { %v2511_v45 = vpop.eup %2510  ;;  %v1454_v22 = vsub.f32 %v4396_v43, %v3781_v53  ;;  %2532 = vpow2.f32 %v1631_v56  ;;  %v1639_v55 = vmul.f32 1.442695, %v1450_v6  ;;  %v1511_v25 = vsub.f32 %v3676_v3, %v3721_v33  ;;  %v4398_v3 = vld [vmem:[#allocation46_spill] sm:$0xff] }
 0x2f9   : > { %v1820_v5 = vadd.f32 %v2499_v40, %v1819_v52  ;;  %v1863_v17 = vadd.f32 %v2509_v35, %v1862_v34  ;;  %v2513_v58 = vpop.eup %2512  ;;  %2534 = vpow2.f32 %v1745_v47  ;;  %v1753_v27 = vmul.f32 1.442695, %v1507_v61  ;;  %v4402_v43 = vld [vmem:[#allocation58_spill] sm:$0xff] }
 0x2fa   : > { %v2515_v18 = vpop.eup %2514  ;;  %v1456_v13 = vsub.f32 %v4397_v26, %v3781_v53  ;;  %2536 = vpow2.f32 %v1635_v31  ;;  %v1643_v52 = vmul.f32 1.442695, %v1452_v1  ;;  %v1513_v14 = vsub.f32 %v3686_v21, %v3721_v33  ;;  %v4399_v21 = vld [vmem:[#allocation49_spill] sm:$0xff] }
 0x2fb   : > { %v1821_v24 = vadd.f32 %v2503_v39, %v1820_v5  ;;  %v1864_v36 = vadd.f32 %v2513_v58, %v1863_v17  ;;  %v2517_v16 = vpop.eup %2516  ;;  %2538 = vpow2.f32 %v1749_v62  ;;  %v1757_v50 = vmul.f32 1.442695, %v1509_v12 }
 0x2fc   : > { %v2519_v37 = vpop.eup %2518  ;;  %v1458_v38 = vsub.f32 %v4398_v3, %v3781_v53  ;;  %2540 = vpow2.f32 %v1639_v55  ;;  %v1647_v23 = vmul.f32 1.442695, %v1454_v22  ;;  %v1515_v19 = vsub.f32 %v3697_v29, %v3721_v33 }
 0x2fd   : > { %v1822_v8 = vadd.f32 %v2507_v49, %v1821_v24  ;;  %v1865_v40 = vadd.f32 %v2517_v16, %v1864_v36  ;;  %v2521_v57 = vpop.eup %2520  ;;  %2542 = vpow2.f32 %v1753_v27  ;;  %v1761_v59 = vmul.f32 1.442695, %v1511_v25  ;;  %v4400_v49 = vld [vmem:[#allocation52_spill] sm:$0xff]  ;;  %v4403_v16 = vld [vmem:[#allocation61_spill] sm:$0xff] }
 0x2fe   : > { %v2523_v5 = vpop.eup %2522  ;;  %v1460_v42 = vsub.f32 %v4399_v21, %v3781_v53  ;;  %2544 = vpow2.f32 %v1643_v52  ;;  %v1651_v46 = vmul.f32 1.442695, %v1456_v13  ;;  %v1213_v24 = vadd.f32 %v1212_v15, %v3818_v11 }
 0x2ff   : > { %v1823_v41 = vadd.f32 %v2511_v45, %v1822_v8  ;;  %v1866_v54 = vadd.f32 %v2521_v57, %v1865_v40  ;;  %v2525_v39 = vpop.eup %2524  ;;  %2546 = vpow2.f32 %v1757_v50  ;;  %v1765_v32 = vmul.f32 1.442695, %v1513_v14  ;;  %v4401_v45 = vld [vmem:[#allocation55_spill] sm:$0xff]  ;;  %v4404_v40 = vld [vmem:[#allocation64_spill] sm:$0xff] }
 0x300   : > { %v2527_v7 = vpop.eup %2526  ;;  %v1462_v61 = vsub.f32 %v4400_v49, %v3781_v53  ;;  %2548 = vpow2.f32 %v1647_v23  ;;  %v1655_v47 = vmul.f32 1.442695, %v1458_v38  ;;  %v1769_v35 = vmul.f32 1.442695, %v1515_v19  ;;  %v4405_v19 = vld [vmem:[#allocation67_spill] sm:$0xff] }
 0x301   : > { %v1824_v63 = vadd.f32 %v2515_v18, %v1823_v41  ;;  %v1867_v6 = vadd.f32 %v2525_v39, %v1866_v54  ;;  %v2529_v56 = vpop.eup %2528  ;;  %2550 = vpow2.f32 %v1761_v59  ;;  %v1464_v12 = vsub.f32 %v4401_v45, %v3781_v53 }
 0x302   : > { %v2531_v34 = vpop.eup %2530  ;;  %2552 = vpow2.f32 %v1651_v46  ;;  %v1659_v11 = vmul.f32 1.442695, %v1460_v42  ;;  %v1214_v62 = vrot.slane %v1213_v24, 1  ;;  %v1466_v22 = vsub.f32 %v4402_v43, %v3781_v53 }
 0x303   : > { %v1825_v10 = vadd.f32 %v2519_v37, %v1824_v63  ;;  %v1868_v8 = vadd.f32 %v2529_v56, %v1867_v6  ;;  %v2533_v1 = vpop.eup %2532  ;;  %2554 = vpow2.f32 %v1765_v32  ;;  %v1663_v55 = vmul.f32 1.442695, %v1462_v61  ;;  %v4407_v61 = vld [vmem:[#allocation73_spill] sm:$0xff] }
 0x304   : > { %v2535_v15 = vpop.eup %2534  ;;  %2556 = vpow2.f32 %v1655_v47  ;;  %v1468_v63 = vsub.f32 %v4403_v16, %v3781_v53  ;;  %v1667_v26 = vmul.f32 1.442695, %v1464_v12  ;;  %v1215_v52 = vadd.f32 %v1214_v62, %v1213_v24  ;;  %v4408_v12 = vld [vmem:[#allocation76_spill] sm:$0xff] }
 0x305   : > { %v1826_v30 = vadd.f32 %v2523_v5, %v1825_v10  ;;  %v1869_v17 = vadd.f32 %v2533_v1, %v1868_v8  ;;  %v2537_v58 = vpop.eup %2536  ;;  %2558 = vpow2.f32 %v1769_v35  ;;  %v1470_v57 = vsub.f32 %v4404_v40, %v3781_v53 }
 0x306   : > { %v2539_v18 = vpop.eup %2538  ;;  %2560 = vpow2.f32 %v1659_v11  ;;  %v1671_v10 = vmul.f32 1.442695, %v1466_v22  ;;  %v1472_v59 = vsub.f32 %v4405_v19, %v3781_v53  ;;  %v1675_v54 = vmul.f32 1.442695, %v1468_v63 }
 0x307   : > { %v1827_v29 = vadd.f32 %v2527_v7, %v1826_v30  ;;  %v1870_v25 = vadd.f32 %v2537_v58, %v1869_v17  ;;  %v2541_v27 = vpop.eup %2540  ;;  %2562 = vpow2.f32 %v1663_v55  ;;  %v1911_v30 = vsub.f32 %v1215_v52, %v3721_v33  ;;  %v4406_v7 = vld [vmem:[#allocation70_spill] sm:$0xff] }
 0x308   : > { %v2543_v13 = vpop.eup %2542  ;;  %2564 = vpow2.f32 %v1667_v26  ;;  %v1474_v24 = vsub.f32 %v4406_v7, %v3781_v53  ;;  %v1679_v32 = vmul.f32 1.442695, %v1470_v57  ;;  %v1476_v47 = vsub.f32 %v4407_v61, %v3781_v53  ;;  %v4415_v61 = vld [vmem:[#allocation97_spill] sm:$0xff] }
 0x309   : > { %v1828_v31 = vadd.f32 %v2531_v34, %v1827_v29  ;;  %v1871_v37 = vadd.f32 %v2541_v27, %v1870_v25  ;;  %v2545_v14 = vpop.eup %2544  ;;  %2566 = vpow2.f32 %v1671_v10  ;;  %v1683_v34 = vmul.f32 1.442695, %v1472_v59  ;;  %v4410_v27 = vld [vmem:[#allocation82_spill] sm:$0xff]  ;;  %v4413_v59 = vld [vmem:[#allocation91_spill] sm:$0xff] }
 0x30a   : > { %v2547_v3 = vpop.eup %2546  ;;  %2568 = vpow2.f32 %v1675_v54  ;;  %v1913_v1 = vmul.f32 1.442695, %v1911_v30  ;;  %v1478_v11 = vsub.f32 %v4408_v12, %v3781_v53  ;;  %v1691_v22 = vmul.f32 1.442695, %v1476_v47 }
 0x30b   : > { %v1829_v41 = vadd.f32 %v2535_v15, %v1828_v31  ;;  %v1872_v38 = vadd.f32 %v2545_v14, %v1871_v37  ;;  %v2549_v23 = vpop.eup %2548  ;;  %2570 = vpow2.f32 %v1679_v32  ;;  %v1687_v15 = vmul.f32 1.442695, %v1474_v24  ;;  %v4414_v24 = vld [vmem:[#allocation94_spill] sm:$0xff] }
 0x30c   : > { %v2551_v39 = vpop.eup %2550  ;;  %2572 = vpow2.f32 %v1683_v34  ;;  %v1695_v16 = vmul.f32 1.442695, %v1478_v11  ;;  %v1236_v10 = vrot.slane %v3867_v2, 4  ;;  %v1488_v54 = vsub.f32 %v4413_v59, %v3781_v53 }
 0x30d   : > { %v1830_v36 = vadd.f32 %v2539_v18, %v1829_v41  ;;  %v1873_v21 = vadd.f32 %v2549_v23, %v1872_v38  ;;  %v2553_v42 = vpop.eup %2552  ;;  %v4409_v41 = vld [vmem:[#allocation79_spill] sm:$0xff]  ;;  %2574 = vpow2.f32 %v1913_v1  ;;  %v1490_v32 = vsub.f32 %v4414_v24, %v3781_v53 }
 0x30e   : > { %v2555_v6 = vpop.eup %2554  ;;  %v1480_v43 = vsub.f32 %v4409_v41, %v3781_v53  ;;  %2576 = vpow2.f32 %v1687_v15  ;;  %v1492_v47 = vsub.f32 %v4415_v61, %v3781_v53  ;;  %v1715_v34 = vmul.f32 1.442695, %v1488_v54  ;;  %v4420_v54 = vld [vmem:[#allocation32_spill] sm:$0xff] }
 0x30f   : > { %v1831_v50 = vadd.f32 %v2543_v13, %v1830_v36  ;;  %v1874_v56 = vadd.f32 %v2553_v42, %v1873_v21  ;;  %v2557_v29 = vpop.eup %2556  ;;  %v1482_v36 = vsub.f32 %v4410_v27, %v3781_v53  ;;  %v4411_v13 = vld [vmem:[#allocation85_spill] sm:$0xff]  ;;  %2578 = vpow2.f32 %v1691_v22 }
 0x310   : > { %v2559_v35 = vpop.eup %2558  ;;  %v1484_v52 = vsub.f32 %v4411_v13, %v3781_v53  ;;  %v1699_v37 = vmul.f32 1.442695, %v1480_v43  ;;  %2580 = vpow2.f32 %v1695_v16  ;;  %v1719_v12 = vmul.f32 1.442695, %v1490_v32  ;;  %v4419_v16 = vld [vmem:[#allocation108_spill] sm:$0xff] }
 0x311   : > { %v1832_v5 = vadd.f32 %v2547_v3, %v1831_v50  ;;  %v1875_v8 = vadd.f32 %v2557_v29, %v1874_v56  ;;  %v2561_v31 = vpop.eup %2560  ;;  %v4412_v50 = vld [vmem:[#allocation88_spill] sm:$0xff]  ;;  %v1703_v38 = vmul.f32 1.442695, %v1482_v36  ;;  %v1512_v61 = vsub.f32 %v3679_v44, %v3781_v53 }
 0x312   : > { %v2563_v17 = vpop.eup %2562  ;;  %v1486_v40 = vsub.f32 %v4412_v50, %v3781_v53  ;;  %2582 = vpow2.f32 %v1699_v37 }
 0x313   : > { %v1833_v46 = vadd.f32 %v2551_v39, %v1832_v5  ;;  %v1876_v62 = vadd.f32 %v2561_v31, %v1875_v8  ;;  %v2565_v18 = vpop.eup %2564  ;;  %v1707_v39 = vmul.f32 1.442695, %v1484_v52  ;;  %2584 = vpow2.f32 %v1703_v38 }
 0x314   : > { %v2567_v26 = vpop.eup %2566  ;;  %v1711_v21 = vmul.f32 1.442695, %v1486_v40 }
 0x315   : > { %v1834_v49 = vadd.f32 %v2555_v6, %v1833_v46  ;;  %v1877_v55 = vadd.f32 %v2563_v17, %v1876_v62  ;;  %v2569_v3 = vpop.eup %2568  ;;  %v1237_v46 = vadd.f32 %v1236_v10, %v3867_v2  ;;  %2586 = vpow2.f32 %v1707_v39  ;;  %v4416_v2 = vld [vmem:[#allocation100_spill] sm:$0xff]  ;;  %v4417_v62 = vld [vmem:[#allocation103_spill] sm:$0xff] }
 0x316   : > { %v2571_v19 = vpop.eup %2570  ;;  %2588 = vpow2.f32 %v1711_v21  ;;  %v1496_v17 = vsub.f32 %v4417_v62, %v3781_v53  ;;  %v1219_v39 = vrot.slane %v4420_v54, 4 }
 0x317   : > { %v1835_v45 = vadd.f32 %v2559_v35, %v1834_v49  ;;  %v1878_v63 = vadd.f32 %v2565_v18, %v1877_v55  ;;  %v2573_v7 = vpop.eup %2572  ;;  %v1238_v1 = vrot.slane %v1237_v46, 2  ;;  %v4418_v55 = vld [vmem:[#allocation106_spill] sm:$0xff] }
 0x318   : > { %v2575_v56 = vpop.eup %2574  ;;  %v1498_v18 = vsub.f32 %v4418_v55, %v3781_v53 }
 0x319   : > { %v1836_v58 = vrot.slane %v1835_v45, 4  ;;  %v1879_v57 = vadd.f32 %v2567_v26, %v1878_v63  ;;  %v2577_v49 = vpop.eup %2576  ;;  %v1239_v43 = vadd.f32 %v1238_v1, %v1237_v46  ;;  %v1500_v63 = vsub.f32 %v4419_v16, %v3781_v53 }
 0x31a   : > { %v2579_v31 = vpop.eup %2578  ;;  %v1731_v26 = vmul.f32 1.442695, %v1496_v17  ;;  %v1735_v50 = vmul.f32 1.442695, %v1498_v18 }
 0x31b   : > { %v1837_v25 = vadd.f32 %v1836_v58, %v1835_v45  ;;  %v1880_v5 = vadd.f32 %v2569_v3, %v1879_v57  ;;  %v1494_v45 = vsub.f32 %v4416_v2, %v3781_v53  ;;  %v2581_v15 = vpop.eup %2580  ;;  %v1723_v58 = vmul.f32 1.442695, %v1492_v47 }
 0x31c   : > { %v2583_v22 = vpop.eup %2582  ;;  %v1240_v52 = vrot.slane %v1239_v43, 1  ;;  %v1504_v3 = vsub.f32 %v3639_v28, %v3781_v53  ;;  %v1739_v38 = vmul.f32 1.442695, %v1500_v63  ;;  %v1508_v28 = vsub.f32 %v3659_v20, %v3781_v53 }
 0x31d   : > { %v1838_v14 = vrot.slane %v1837_v25, 2  ;;  %v1881_v42 = vadd.f32 %v2571_v19, %v1880_v5  ;;  %v2585_v36 = vpop.eup %2584 }
 0x31e   : > { %v4012_v5 = vadd.f32 %v1240_v52, %v1239_v43  ;;  %v1755_v20 = vmul.f32 1.442695, %v1508_v28 }
 0x31f   : > { %v1839_v23 = vadd.f32 %v1838_v14, %v1837_v25  ;;  %v1882_v29 = vadd.f32 %v2573_v7, %v1881_v42  ;;  %v1727_v25 = vmul.f32 1.442695, %v1494_v45  ;;  %v2587_v37 = vpop.eup %2586  ;;  %v1502_v14 = vsub.f32 %v3629_v4, %v3781_v53 }
 0x320   : > { %v2589_v40 = vpop.eup %2588  ;;  %v1506_v4 = vsub.f32 %v3649_v51, %v3781_v53  ;;  %v1747_v7 = vmul.f32 1.442695, %v1504_v3  ;;  %v1510_v51 = vsub.f32 %v3669_v60, %v3781_v53  ;;  %v1516_v60 = vsub.f32 %v3701_v9, %v3781_v53 }
 0x321   : > { %v1840_v30 = vrot.slane %v1839_v23, 1  ;;  %v1883_v8 = vadd.f32 %v2577_v49, %v1882_v29  ;;  %v1763_v45 = vmul.f32 1.442695, %v1512_v61 }
 0x322   : > { %v1751_v29 = vmul.f32 1.442695, %v1506_v4  ;;  %v1759_v1 = vmul.f32 1.442695, %v1510_v51 }
 0x323   : > { %v1841_v6 = vadd.f32 %v1840_v30, %v1839_v23  ;;  %v1884_v11 = vadd.f32 %v2579_v31, %v1883_v8  ;;  %v1743_v30 = vmul.f32 1.442695, %v1502_v14  ;;  %v1514_v8 = vsub.f32 %v3689_v0, %v3781_v53 }
 0x325   : > { %v1917_v35 = vsub.f32 %v1841_v6, %v2575_v56  ;;  %v1885_v41 = vadd.f32 %v2581_v15, %v1884_v11  ;;  %v1220_v56 = vadd.f32 %v1219_v39, %v4420_v54  ;;  %v1767_v15 = vmul.f32 1.442695, %v1514_v8  ;;  %v1925_v8 = vld [vmem:[#allocation2] sm:$0x1] }
 0x327   : > { %2590 = vlog2.f32 %v1917_v35  ;;  %v1886_v27 = vadd.f32 %v2583_v22, %v1885_v41  ;;  %v1221_v35 = vrot.slane %v1220_v56, 2 }
 0x328   : > { %2592 = vpow2.f32 %v1715_v34 }
 0x329   : > { %2594 = vpow2.f32 %v1719_v12  ;;  %v1887_v13 = vadd.f32 %v2585_v36, %v1886_v27  ;;  %v1222_v44 = vadd.f32 %v1221_v35, %v1220_v56 }
 0x32a   : > { %2596 = vpow2.f32 %v1723_v58  ;;  %v1771_v58 = vmul.f32 1.442695, %v1516_v60 }
 0x32b   : > { %2598 = vpow2.f32 %v1727_v25  ;;  %v1888_v57 = vadd.f32 %v2587_v37, %v1887_v13  ;;  %v1223_v43 = vrot.slane %v1222_v44, 1 }
 0x32c   : > { %2600 = vpow2.f32 %v1731_v26 }
 0x32d   : > { %v1889_v23 = vadd.f32 %v2589_v40, %v1888_v57  ;;  %2602 = vpow2.f32 %v1735_v50  ;;  %v1224_v25 = vadd.f32 %v1223_v43, %v1222_v44  ;;  %v4427_v44 = vld [vmem:[#allocation24_spill] sm:$0xff] (!%p2251_p10)  ;;  %v4431_v43 = vld [vmem:[#allocation19_spill] sm:$0xff] (!%p2251_p10) }
 0x32e   : > { %2604 = vpow2.f32 %v1739_v38  ;;  %v1245_v38 = vrot.slane %v3870_v48, 4 }
 0x32f   : > { %2606 = vpow2.f32 %v1743_v30  ;;  %v1912_v26 = vsub.f32 %v1224_v25, %v3781_v53 }
 0x330   : > { %2608 = vpow2.f32 %v1747_v7 }
 0x331   : > { %v2591_v10 = vpop.eup %2590  ;;  %2610 = vpow2.f32 %v1751_v29  ;;  %v1915_v50 = vmul.f32 1.442695, %v1912_v26  ;;  %v4436_v26 = vld [vmem:[#allocation28_spill] sm:$0xff] (!%p2251_p10) }
 0x332   : > { %v1920_v19 = vmul.f32 0.6931472, %v2591_v10  ;;  %v2593_v59 = vpop.eup %2592  ;;  %2612 = vpow2.f32 %v1755_v20 }
 0x333   : > { %v1890_v21 = vadd.f32 %v2593_v59, %v1889_v23  ;;  %v2595_v46 = vpop.eup %2594  ;;  %2614 = vpow2.f32 %v1759_v1  ;;  %v1246_v59 = vadd.f32 %v1245_v38, %v3870_v48 }
 0x334   : > { %v4018_v42 = vadd.f32 %v1920_v19, %v3721_v33  ;;  %v2597_v6 = vpop.eup %2596  ;;  %2616 = vpow2.f32 %v1763_v45  ;;  %v4425_v45 = vld [vmem:[#allocation17_spill] sm:$0xff] (!%p2251_p10) }
 0x335   : > { %v1891_v24 = vadd.f32 %v2595_v46, %v1890_v21  ;;  %v2599_v49 = vpop.eup %2598  ;;  %2618 = vpow2.f32 %v1767_v15  ;;  %v1247_v30 = vrot.slane %v1246_v59, 2  ;;  %v4428_v15 = vld [vmem:[#allocation25_spill] sm:$0xff] (!%p2251_p10) }
 0x336   : > { %v1926_v32 = vsub.f32 %v4018_v42, %v4012_v5  ;;  %v2601_v34 = vpop.eup %2600  ;;  %2620 = vpow2.f32 %v1771_v58  ;;  %v4421_v5 = vld [vmem:[#allocation13_spill] sm:$0xff] (!%p2251_p10)  ;;  %v4422_v42 = vld [vmem:[#allocation14_spill] sm:$0xff] (!%p2251_p10) }
 0x337   : > { %v1892_v33 = vadd.f32 %v2597_v6, %v1891_v24  ;;  %v2603_v2 = vpop.eup %2602  ;;  %2622 = vpow2.f32 %v1915_v50  ;;  %v1248_v21 = vadd.f32 %v1247_v30, %v1246_v59 }
 0x338   : > { %v2605_v11 = vpop.eup %2604  ;;  %v1929_v51 = vsel %vm1928_vm2, %v1926_v32, 0.0  ;;  %v1949_v32 = vadd.f32 (!%p2251_p10), %v4422_v42, %v4421_v5 }
 0x339   : > { %v1893_v47 = vadd.f32 %v2599_v49, %v1892_v33  ;;  %v2607_v17 = vpop.eup %2606  ;;  %v1249_v46 = vrot.slane %v1248_v21, 1 }
 0x33a   : > { %v2609_v0 = vpop.eup %2608 }
 0x33b   : > { %v1894_v31 = vadd.f32 %v2601_v34, %v1893_v47  ;;  %v2611_v55 = vpop.eup %2610  ;;  %v1250_v7 = vadd.f32 %v1249_v46, %v1248_v21 }
 0x33c   : > { %v2613_v9 = vpop.eup %2612 }
 0x33d   : > { %v1895_v12 = vadd.f32 %v2603_v2, %v1894_v31  ;;  %v2615_v36 = vpop.eup %2614  ;;  %v4423_v31 = vld [vmem:[#allocation21_spill] sm:$0xff] (!%p2251_p10)  ;;  %v4424_v2 = vld [vmem:[#allocation22_spill] sm:$0xff] (!%p2251_p10) }
 0x33e   : > { %v2617_v63 = vpop.eup %2616  ;;  %v1958_v60 = vadd.f32 (!%p2251_p10), %v4424_v2, %v4423_v31 }
 0x33f   : > { %v1896_v62 = vadd.f32 %v2605_v11, %v1895_v12  ;;  %v2619_v52 = vpop.eup %2618  ;;  %v4426_v12 = vld [vmem:[#allocation18_spill] sm:$0xff] (!%p2251_p10) }
 0x340   : > { %v2621_v14 = vpop.eup %2620  ;;  %v1967_v11 = vadd.f32 (!%p2251_p10), %v4426_v12, %v4425_v45 }
 0x341   : > { %v1897_v41 = vadd.f32 %v2607_v17, %v1896_v62  ;;  %v2623_v39 = vpop.eup %2622  ;;  %v1976_v62 = vadd.f32 (!%p2251_p10), %v4428_v15, %v4427_v44  ;;  %v4429_v17 = vld [vmem:[#allocation15_spill] sm:$0xff] (!%p2251_p10) }
 0x342   : > { %v1950_v58 = vadd.f32 (!%p2251_p10), %v1949_v32, %v4429_v17 }
 0x343   : > { %v1898_v22 = vadd.f32 %v2609_v0, %v1897_v41  ;;  %v4430_v41 = vld [vmem:[#allocation23_spill] sm:$0xff] (!%p2251_p10) }
 0x344   : > { %v1959_v0 = vadd.f32 (!%p2251_p10), %v1958_v60, %v4430_v41 }
 0x345   : > { %v1899_v18 = vadd.f32 %v2611_v55, %v1898_v22  ;;  %v1968_v22 = vadd.f32 (!%p2251_p10), %v1967_v11, %v4431_v43  ;;  %v4432_v55 = vld [vmem:[#allocation27_spill] sm:$0xff] (!%p2251_p10) }
 0x347   : > { %v1900_v27 = vadd.f32 %v2613_v9, %v1899_v18  ;;  %v1977_v18 = vadd.f32 (!%p2251_p10), %v1976_v62, %v4432_v55  ;;  %v4433_v9 = vld [vmem:[#allocation16_spill] sm:$0xff] (!%p2251_p10) }
 0x348   : > { %v1951_v25 = vadd.f32 (!%p2251_p10), %v1950_v58, %v4433_v9 }
 0x349   : > { %v1901_v16 = vadd.f32 %v2615_v36, %v1900_v27  ;;  %v4434_v27 = vld [vmem:[#allocation26_spill] sm:$0xff] (!%p2251_p10) }
 0x34a   : > { %v1960_v36 = vadd.f32 (!%p2251_p10), %v1959_v0, %v4434_v27 }
 0x34b   : > { %v1902_v13 = vadd.f32 %v2617_v63, %v1901_v16  ;;  %v4435_v16 = vld [vmem:[#allocation20_spill] sm:$0xff] (!%p2251_p10) }
 0x34c   : > { %v1969_v63 = vadd.f32 (!%p2251_p10), %v1968_v22, %v4435_v16 }
 0x34d   : > { %v1903_v37 = vadd.f32 %v2619_v52, %v1902_v13  ;;  %v1978_v13 = vadd.f32 (!%p2251_p10), %v1977_v18, %v4436_v26  ;;  %v1952_v52 = vrot.slane (!%p2251_p10), %v1951_v25, 4 }
 0x34f   : > { %v1904_v40 = vadd.f32 %v2621_v14, %v1903_v37  ;;  %v1961_v37 = vrot.slane (!%p2251_p10), %v1960_v36, 4  ;;  %v1970_v14 = vrot.slane (!%p2251_p10), %v1969_v63, 4  ;;  %v1979_v50 = vrot.slane (!%p2251_p10), %v1978_v13, 4 }
 0x351   : > { %v1905_v57 = vrot.slane %v1904_v40, 4 }
 0x353   : > { %v1906_v10 = vadd.f32 %v1905_v57, %v1904_v40  ;;  %v1953_v40 = vadd.f32 (!%p2251_p10), %v1952_v52, %v1951_v25  ;;  %v1962_v57 = vadd.f32 (!%p2251_p10), %v1961_v37, %v1960_v36 }
 0x355   : > { %v1907_v3 = vrot.slane %v1906_v10, 2  ;;  %v1954_v38 = vrot.slane (!%p2251_p10), %v1953_v40, 2 }
 0x357   : > { %v1908_v23 = vadd.f32 %v1907_v3, %v1906_v10  ;;  %v1971_v10 = vadd.f32 (!%p2251_p10), %v1970_v14, %v1969_v63  ;;  %v1980_v3 = vadd.f32 (!%p2251_p10), %v1979_v50, %v1978_v13 }
 0x359   : > { %v1909_v19 = vrot.slane %v1908_v23, 1  ;;  %v1981_v59 = vrot.slane (!%p2251_p10), %v1980_v3, 2 }
 0x35b   : > { %v1910_v54 = vadd.f32 %v1909_v19, %v1908_v23  ;;  %v1963_v23 = vrot.slane (!%p2251_p10), %v1962_v57, 2  ;;  %v1972_v19 = vrot.slane (!%p2251_p10), %v1971_v10, 2  ;;  %v1982_v30 = vadd.f32 (!%p2251_p10), %v1981_v59, %v1980_v3 }
 0x35d   : > { %v1918_v4 = vsub.f32 %v1910_v54, %v2623_v39  ;;  %v1955_v54 = vadd.f32 (!%p2251_p10), %v1954_v38, %v1953_v40  ;;  %v1964_v39 = vadd.f32 (!%p2251_p10), %v1963_v23, %v1962_v57 }
 0x35f   : > { %2624 = vlog2.f32 %v1918_v4  ;;  %v1973_v4 = vadd.f32 (!%p2251_p10), %v1972_v19, %v1971_v10  ;;  %v1956_v21 = vrot.slane (!%p2251_p10), %v1955_v54, 1  ;;  %v1965_v46 = vrot.slane (!%p2251_p10), %v1964_v39, 1 }
 0x369   : > { %v2625_v28 = vpop.eup %2624 }
 0x36a   : > { %v1922_v24 = vmul.f32 0.6931472, %v2625_v28  ;;  %v1974_v28 = vrot.slane (!%p2251_p10), %v1973_v4, 1 }
 0x36c   : > { %v1924_v6 = vadd.f32 %v1922_v24, %v3781_v53  ;;  %v1957_v24 = vadd.f32 (!%p2251_p10), %v1956_v21, %v1955_v54 }
 0x36e   : > { %v1927_v56 = vsub.f32 %v1924_v6, %v1250_v7  ;;  %v1983_v7 = vrot.slane (!%p2251_p10), %v1982_v30, 1  ;;  %v1966_v6 = vadd.f32 (!%p2251_p10), %v1965_v46, %v1964_v39 }
 0x370   : > { %v1930_v48 = vsel %vm1928_vm2, %v1927_v56, 0.0  ;;  %v1975_v56 = vadd.f32 (!%p2251_p10), %v1974_v28, %v1973_v4 }
 0x371   : > { %v1931_v29 = vadd.f32 %v1930_v48, %v1929_v51  ;;  %v1984_v51 = vadd.f32 (!%p2251_p10), %v1983_v7, %v1982_v30  ;;  %v1998_v48 = vsel (!%p2251_p10), %vm1928_vm2, %v1957_v24, 0.0 }
 0x373   : > { %1932 = vadd.xlane.f32.xlu0 %v1931_v29  ;;  %v1999_v29 = vsel (!%p2251_p10), %vm1928_vm2, %v1966_v6, 0.0 }
 0x400   : > { %v1933_v33 = vpop.xlane.xlu0 %1932 }
 0x401   : > { %v1934_v49 = vrot.slane %v1933_v33, 4 }
 0x403   : > { %v1935_v61 = vadd.f32 %v1934_v49, %v1933_v33  ;;  %v2021_v33 = vsel (!%p2251_p10), %vm1928_vm2, %v1975_v56, 0.0  ;;  %v2023_v49 = vsel (!%p2251_p10), %vm1928_vm2, %v1984_v51, 0.0 }
 0x405   : > { %v1936_v20 = vrot.slane %v1935_v61, 2 }
 0x407   : > { %v1937_v47 = vadd.f32 %v1936_v20, %v1935_v61  ;;  %v2000_v61 = vadd.f32 (!%p2251_p10), %v1999_v29, %v1998_v48  ;;  %v2024_v20 = vadd.f32 (!%p2251_p10), %v2023_v49, %v2021_v33 }
 0x409   : > { %v1938_v34 = vrot.slane %v1937_v47, 1  ;;  %2005 = vadd.xlane.f32.xlu0 (!%p2251_p10), %v2000_v61 }
 0x40b   : > { %v1939_v35 = vadd.f32 %v1938_v34, %v1937_v47 }
 0x40d   : > { %2270 = vpush %v1939_v35  ;;  %2025 = vadd.xlane.f32.xlu0 (!%p2251_p10), %v2024_v20 }
 0x43c   : > { %1948 = sbr.rel (%p2251_p10) target bundleno = 1485 (0x5cd), region = 52 }
 0x43e   : > { %s2271_s23 = spop %2270 }
 0x43f   : > { %v1941_v53 = vstv %s2271_s23 }
 0x440   : > { %v1942_v1 = vadd.f32 %v1941_v53, %v1925_v8 }
 0x442   : > { %1944 = vst.msk [vmem:[#allocation2] sm:$0x1] %vm1943_vm3, %v1942_v1 }
 0x449   : > { %v2078_v4 = vld [vmem:[#allocation2] sm:$0x1] }
 0x44a   : > { %v2080_v30 = vmul.f32 0.001953125, %v2078_v4 }
 0x496   : > { %v2006_v47 = vpop.xlane.xlu0 %2005 }
 0x497   : > { %v2007_v34 = vrot.slane %v2006_v47, 4 }
 0x499   : > { %v2008_v35 = vadd.f32 %v2007_v34, %v2006_v47 }
 0x49a   : > { %v2026_v8 = vpop.xlane.xlu0 %2025 }
 0x49b   : > { %v2009_v53 = vrot.slane %v2008_v35, 2  ;;  %v2027_v1 = vrot.slane %v2026_v8, 4 }
 0x49d   : > { %v2028_v5 = vadd.f32 %v2027_v1, %v2026_v8  ;;  %v2010_v42 = vadd.f32 %v2009_v53, %v2008_v35 }
 0x49f   : > { %v2029_v32 = vrot.slane %v2028_v5, 2  ;;  %v2011_v31 = vrot.slane %v2010_v42, 1 }
 0x4a1   : > { %v2030_v2 = vadd.f32 %v2029_v32, %v2028_v5  ;;  %v2012_v60 = vadd.f32 %v2011_v31, %v2010_v42 }
 0x4a3   : > { %2272 = vpush %v2012_v60  ;;  %v2031_v45 = vrot.slane %v2030_v2, 1 }
 0x4a5   : > { %v2032_v12 = vadd.f32 %v2031_v45, %v2030_v2 }
 0x4a7   : > { %2274 = vpush %v2032_v12 }
 0x4d4   : > { %s2273_s22 = spop %2272 }
 0x4d5   : > { %v2034_v11 = vstv %s2273_s22 }
 0x4d6   : > { %2630 = vrcp.f32 %v2034_v11 }
 0x4d8   : > { %s2275_s28 = spop %2274 }
 0x4d9   : > { %v2035_v44 = vstv %s2275_s28 }
 0x4da   : > { %2632 = vrcp.f32 %v2035_v44 }
 0x4e0   : > { %v2631_v15 = vpop.eup %2630 }
 0x4e1   : > { %v2041_v62 = vmul.f32 %v2631_v15, %v1957_v24  ;;  %v2043_v17 = vmul.f32 %v2631_v15, %v1966_v6 }
 0x4e3   : > { %2634 = vlog2.f32 %v2041_v62 }
 0x4e4   : > { %v2633_v58 = vpop.eup %2632  ;;  %2636 = vlog2.f32 %v2043_v17 }
 0x4e5   : > { %v2045_v41 = vmul.f32 %v2633_v58, %v1975_v56  ;;  %v2047_v0 = vmul.f32 %v2633_v58, %v1984_v51 }
 0x4e7   : > { %2638 = vlog2.f32 %v2045_v41 }
 0x4e8   : > { %2640 = vlog2.f32 %v2047_v0 }
 0x4ed   : > { %v2635_v43 = vpop.eup %2634 }
 0x4ee   : > { %v2637_v22 = vpop.eup %2636  ;;  %v2049_v55 = vmul.f32 0.6931472, %v2635_v43 }
 0x4ef   : > { %v2051_v18 = vmul.f32 0.6931472, %v2637_v22 }
 0x4f0   : > { %v2056_v9 = vmul.f32 %v2049_v55, %v2041_v62 }
 0x4f1   : > { %v2639_v25 = vpop.eup %2638  ;;  %v2057_v27 = vmul.f32 %v2051_v18, %v2043_v17 }
 0x4f2   : > { %v2641_v36 = vpop.eup %2640  ;;  %v2053_v16 = vmul.f32 0.6931472, %v2639_v25  ;;  %v2060_v63 = vsel %vm1928_vm2, %v2056_v9, 0.0 }
 0x4f3   : > { %v2055_v26 = vmul.f32 0.6931472, %v2641_v36  ;;  %v2061_v13 = vsel %vm1928_vm2, %v2057_v27, 0.0 }
 0x4f4   : > { %v2058_v52 = vmul.f32 %v2053_v16, %v2045_v41  ;;  %v2062_v14 = vadd.f32 %v2061_v13, %v2060_v63 }
 0x4f5   : > { %v2059_v37 = vmul.f32 %v2055_v26, %v2047_v0 }
 0x4f6   : > { %v2063_v50 = vsel %vm1928_vm2, %v2058_v52, 0.0 }
 0x4f7   : > { %v2064_v40 = vadd.f32 %v2063_v50, %v2062_v14  ;;  %v2065_v57 = vsel %vm1928_vm2, %v2059_v37, 0.0 }
 0x4f9   : > { %v2066_v10 = vadd.f32 %v2065_v57, %v2064_v40 }
 0x4fb   : > { %2067 = vadd.xlane.f32.xlu1 %v2066_v10 }
 0x588   : > { %v2068_v3 = vpop.xlane.xlu1 %2067 }
 0x589   : > { %v2069_v38 = vrot.slane %v2068_v3, 4 }
 0x58b   : > { %v2070_v23 = vadd.f32 %v2069_v38, %v2068_v3 }
 0x58d   : > { %v2071_v19 = vrot.slane %v2070_v23, 2 }
 0x58f   : > { %v2072_v59 = vadd.f32 %v2071_v19, %v2070_v23 }
 0x591   : > { %v2073_v54 = vrot.slane %v2072_v59, 1 }
 0x593   : > { %v2074_v39 = vadd.f32 %v2073_v54, %v2072_v59 }
 0x595   : > { %2276 = vpush %v2074_v39 }
 0x5c6   : > { %s2277_s27 = spop %2276 }
 0x5c7   : > { %v2076_v21 = vstv %s2277_s27 }
 0x5c8   : > { %v2077_v46 = vadd.f32 11.090355, %v2076_v21 }
 0x5ca   : > { %v2081_v28 = vadd.f32 %v2080_v30, %v2077_v46 }
 0x5cc   : > { %2082 = vst.msk [vmem:[#allocation9] sm:$0x1] %vm1943_vm3, %v2081_v28 }
 0x5cd PF: > { %p2304_p0 = scmp.eq.s32.totalorder %s2924_s7, 1  ;;  %s2809_s5 = smov [#allocation9]  }
 0x5ce   : > { %s2090_s26 = sshll.u32 %s2809_s5, 4  ;;  %s2091_s26 = int_to_ptr.vmem [resolvable:$true] %s2090_s26 }
 0x5cf   : > { %s2730_s29 = scalar_lea.vmem %s2091_s26, 16  ;;  %s2736_s12 = scalar_lea.vmem %s2091_s26, 32 }
 0x5d0   : > { %p2731_p6 = scmp.ne.s32.totalorder %s2091_s26, %s2730_s29  ;;  %p2737_p9 = scmp.lt.s32.totalorder %s2091_s26, %s2091_s26 }
 0x5d1   : > { %p2738_p13 = scmp.lt.s32.totalorder %s2736_s12, %s2730_s29 }
 0x5d2   : > { %p2732_p8 = pnand %p2731_p6, %p2304_p0 }
 0x5d3   : > { %p2739_p7 = por %p2738_p13, %p2737_p9 }
 0x5d4   : > { %p2733_p11 = pneg %p2732_p8 }
 0x5d6   : > { %p2740_p12 = pnand %p2739_p7, %p2733_p11 }
 0x5d8   : > { %2743 = shalt.err (!%p2740_p12)
}
 0x5d9   : > { %s2744_s30 = scalar_lea.hbm %s4108_s3, 16 }
 0x5da   : > { %p2745_p1 = scmp.ne.s32.totalorder %s4108_s3, %s2744_s30  ;;  %p2750_p3 = scmp.lt.u32.totalorder %s2744_s30, %s4108_s3 }
 0x5dc   : > { %p2746_p4 = pnand %p2745_p1, %p2304_p0 }
 0x5de   : > { %p2747_p5 = pneg %p2746_p4 }
 0x5e0   : > { %p2752_p2 = pnand %p2750_p3, %p2747_p5 }
 0x5e2   : > { %2755 = shalt.err (!%p2752_p2)
}
 0x5e3   : > { %2287 = dma.vmem_to_hbm [thread:$0]  (%p2304_p0), %s2091_s26, 16, %s4108_s3, [#allocation5]  }
 0x5e4   : > { %2781 = dma.done.wait (%p2304_p0), [#allocation5], 16  }
 0x5e5   : > { %2783 = vsyncadd (%p2304_p0), [#allocation5], 4294967280 }
 0x5e6 PF: > { %p15_p10 = scmp.ge.s32.totalorder %s2851_s16, 4   ;;  %s4437_s12 = smov %s2790_s13 }
 0x5e7   : > { %s4438_s13 = smov %s2794_s14  ;;  %s4439_s14 = smov %s2860_s19 }
 0x5e8   : > { %s4440_s15 = smov %s2851_s16  ;;  %17 = sbr.rel (!%p15_p10) target bundleno = 5 (0x5), region = 93 }
 0x5ef   :  { %2103 = vsyncpa [#allocation4], 1 }
 0x5f0   :  { %2105 = vsyncpa [#allocation4 + $0x1], 1 }
 0x5f1   :  { %2106 = vsyncpa [#allocation7], 1 }
 0x5f2   :  { %2108 = vsyncpa [#allocation7 + $0x1], 1 }
 0x5f3   :  { %2109 = vsyncpa [#allocation5], 1 }
 0x5f4   :  { %2111 = vsyncpa [#allocation5 + $0x1], 1 }

</bundles_post_ra>
